<compile_context>
chip_gen: v7x
topology: tpu7x:2x2x1
jax: 0.10.0
libtpu: 0.0.40
codegen_flags: <defaults>
</compile_context>

<pallas_src>
import math

import jax
import jax.numpy as jnp
from jax.experimental import pallas as pl
from jax.experimental.pallas import tpu as pltpu

PRELU_ALPHA = 0.25                         # nn.PReLU() default init
LN_EPS = 1e-5                              # nn.LayerNorm default eps
BN_SCALE = 1.0 / math.sqrt(1.0 + 1e-5)     # eval-mode BatchNorm1d, fresh running stats


def _round_up(x, m):
    return ((x + m - 1) // m) * m


def _block_diag(w):
    """(C, M, N) per-channel weights -> (C*M, C*N) block-diagonal matrix."""
    C, M, N = w.shape
    eye = jnp.eye(C, dtype=w.dtype)
    return jnp.einsum("cmn,cd->cmdn", w, eye).reshape(C * M, C * N)


# ---------------------------------------------------------------------------
# Fused forward kernel: one row tile of nodes per grid step.
# ---------------------------------------------------------------------------
def fused_forward_kernel(
    xf_ref, xl_ref, tgt_ref, lemb_ref,
    w1f_ref, b1f_ref, g1f_ref, be1f_ref,
    w2f_ref, b2f_ref, g2f_ref, be2f_ref,
    w1l_ref, b1l_ref, g1l_ref, be1l_ref,
    w2l_ref, b2l_ref, g2l_ref, be2l_ref,
    wcatf_ref, wcatl_ref, bcat_ref, wres_ref,
    wlr1_ref, wlr2_ref,
    wlf1_ref, wlf2_ref, wlf3_ref, blf3_ref,
    o_ref,
):
    def prelu(v):
        return jnp.where(v > 0, v, PRELU_ALPHA * v)

    def mm(a, w_ref):
        # bf16 MXU inputs, f32 accumulation.
        return jnp.dot(a.astype(jnp.bfloat16), w_ref[...],
                       preferred_element_type=jnp.float32)

    def ln_prelu(h, g_ref, be_ref):
        # LayerNorm over the packed (C*H) lane axis == nn.LayerNorm([C, H]) per node.
        mean = jnp.mean(h, axis=-1, keepdims=True)
        d = h - mean
        var = jnp.mean(d * d, axis=-1, keepdims=True)
        h = d * jax.lax.rsqrt(var + LN_EPS) * g_ref[...] + be_ref[...]
        return prelu(h)

    def proj(x, w1, b1, g1, be1, w2, b2, g2, be2):
        # grouped Conv1d1x1 (block-diag matmul) -> LN([C,H]) -> PReLU, twice.
        h = mm(x, w1) + b1[...]
        h = ln_prelu(h, g1, be1)
        h = mm(h, w2) + b2[...]
        return ln_prelu(h, g2, be2)

    hf = proj(xf_ref[...], w1f_ref, b1f_ref, g1f_ref, be1f_ref,
              w2f_ref, b2f_ref, g2f_ref, be2f_ref)            # (tb, F*H)
    hl = proj(xl_ref[...], w1l_ref, b1l_ref, g1l_ref, be1l_ref,
              w2l_ref, b2l_ref, g2l_ref, be2l_ref)            # (tb, L*H)

    # concat_project (split along the K axis so no in-kernel lane concat) + residual
    x = mm(hf, wcatf_ref) + mm(hl, wcatl_ref) + bcat_ref[...] + mm(tgt_ref[...], wres_ref)
    x = prelu(x)

    # lr_output: Linear -> BN -> PReLU -> Linear -> BN  (BN scale folded into weights)
    h = prelu(mm(x, wlr1_ref))
    h = mm(h, wlr2_ref)

    # label_fc residual branch (BN scales folded)
    l = prelu(mm(lemb_ref[...], wlf1_ref))
    l = prelu(mm(l, wlf2_ref))
    l = mm(l, wlf3_ref) + blf3_ref[...]

    o_ref[...] = (h + l).astype(o_ref.dtype)


# ---------------------------------------------------------------------------
# Wrapper
# ---------------------------------------------------------------------------
def adaptive_hgnn_mag_forward(feats_dict, layer_feats_dict, label_emb, kparams,
                              tgt_key, tb=512):
    tgt = feats_dict[tgt_key]                                   # input_drop = identity (eval)
    B = tgt.shape[0]
    nclass = kparams["nclass"]

    # TODO(synk): adaptive_reweighting / SimpleAdaptiveHConv not defined in source; identity.
    # TODO(synk): Transformer semantic_aggr_layers not defined in source; identity.
    # Per-node lane-dense packing (== torch.stack(dim=1).reshape(B, -1)); activations
    # pre-cast to bf16 to halve per-step DMA traffic (matmul inputs are bf16 anyway).
    xf = jnp.concatenate(list(feats_dict.values()), axis=1).astype(jnp.bfloat16)
    xl = jnp.concatenate(list(layer_feats_dict.values()), axis=1).astype(jnp.bfloat16)
    tgt_p = tgt.astype(jnp.bfloat16)
    lemb = label_emb.astype(jnp.bfloat16)

    fp, lp, hp = kparams["feat_proj"], kparams["label_proj"], kparams["head"]
    nc_pad = hp["w_lr2"].shape[1]

    # batch tile: big (feeds the MXU / amortises grid overhead), padded if ragged
    tb = max(16, min(tb, _round_up(B, 16)))
    B_pad = _round_up(B, tb)
    if B_pad != B:
        pad = ((0, B_pad - B), (0, 0))
        xf, xl, tgt_p, lemb = (jnp.pad(a, pad) for a in (xf, xl, tgt_p, lemb))

    weight_args = [
        fp["w1"], fp["b1"], fp["g1"], fp["be1"],
        fp["w2"], fp["b2"], fp["g2"], fp["be2"],
        lp["w1"], lp["b1"], lp["g1"], lp["be1"],
        lp["w2"], lp["b2"], lp["g2"], lp["be2"],
        hp["w_cat_f"], hp["w_cat_l"], hp["b_cat"], hp["w_res"],
        hp["w_lr1"], hp["w_lr2"],
        hp["w_lf1"], hp["w_lf2"], hp["w_lf3"], hp["b_lf3"],
    ]

    def full_spec(a):
        nd = a.ndim
        return pl.BlockSpec(a.shape, lambda i, nd=nd: (0,) * nd)

    def row_spec(d):
        return pl.BlockSpec((tb, d), lambda i: (i, 0))

    out = pl.pallas_call(
        fused_forward_kernel,
        out_shape=jax.ShapeDtypeStruct((B_pad, nc_pad), jnp.float32),
        grid=(B_pad // tb,),
        in_specs=[row_spec(xf.shape[1]), row_spec(xl.shape[1]),
                  row_spec(tgt_p.shape[1]), row_spec(lemb.shape[1])]
                 + [full_spec(a) for a in weight_args],
        out_specs=pl.BlockSpec((tb, nc_pad), lambda i: (i, 0)),
        compiler_params=pltpu.CompilerParams(
            dimension_semantics=("parallel",),
            vmem_limit_bytes=48 * 1024 * 1024),
    )(xf, xl, tgt_p, lemb, *weight_args)

    return out[:B, :nclass]


# ---------------------------------------------------------------------------
# Parameter preparation: pack module params into the kernel layout
#   - block-diagonal grouped-conv weights, (1, C*H) flattened LN params
#   - bf16 weights, eval-mode BN scale folded in, output dim padded to 128 lanes
# ---------------------------------------------------------------------------
def prepare_params(module_params, nclass):
    fp, lp, hp = (module_params["feat_proj"], module_params["label_proj"],
                  module_params["head"])

    def pack_proj(p):
        C, _, H = p["w1"].shape
        flat = lambda a: a.reshape(1, C * H).astype(jnp.float32)
        return {
            "w1": _block_diag(p["w1"]).astype(jnp.bfloat16),
            "b1": flat(p["b1"]), "g1": flat(p["ln1_w"]), "be1": flat(p["ln1_b"]),
            "w2": _block_diag(p["w2"]).astype(jnp.bfloat16),
            "b2": flat(p["b2"]), "g2": flat(p["ln2_w"]), "be2": flat(p["ln2_b"]),
        }

    F, _, H = fp["w1"].shape
    nc_pad = _round_up(max(nclass, 128), 128)

    def pad_out(w):
        return jnp.pad(w, ((0, 0), (0, nc_pad - w.shape[1])))

    head = {
        "w_cat_f": hp["w_cat"][: F * H].astype(jnp.bfloat16),
        "w_cat_l": hp["w_cat"][F * H:].astype(jnp.bfloat16),
        "b_cat": hp["b_cat"].astype(jnp.float32),
        "w_res": hp["w_res"].astype(jnp.bfloat16),
        "w_lr1": (hp["w_lr1"] * BN_SCALE).astype(jnp.bfloat16),
        "w_lr2": pad_out(hp["w_lr2"] * BN_SCALE).astype(jnp.bfloat16),
        "w_lf1": (hp["w_lf1"] * BN_SCALE).astype(jnp.bfloat16),
        "w_lf2": (hp["w_lf2"] * BN_SCALE).astype(jnp.bfloat16),
        "w_lf3": pad_out(hp["w_lf3"]).astype(jnp.bfloat16),
        "b_lf3": pad_out(hp["b_lf3"]).astype(jnp.float32),
    }
    return {"feat_proj": pack_proj(fp), "label_proj": pack_proj(lp),
            "head": head, "nclass": nclass}


# ---------------------------------------------------------------------------
# Pure-JAX references
#   ref_forward_packed : replica of the kernel math (same bf16 casts / packing)
#   ref_forward_f32    : module semantics in full f32 (PyTorch eval-mode math)
# ---------------------------------------------------------------------------
def ref_forward_packed(feats_dict, layer_feats_dict, label_emb, kp, tgt_key):
    def mm(a, w):
        return jnp.dot(a.astype(jnp.bfloat16), w, preferred_element_type=jnp.float32)

    def prelu(v):
        return jnp.where(v > 0, v, PRELU_ALPHA * v)

    def ln_prelu(h, g, be):
        mean = jnp.mean(h, axis=-1, keepdims=True)
        d = h - mean
        var = jnp.mean(d * d, axis=-1, keepdims=True)
        return prelu(d * jax.lax.rsqrt(var + LN_EPS) * g + be)

    def proj(x, q):
        h = ln_prelu(mm(x, q["w1"]) + q["b1"], q["g1"], q["be1"])
        return ln_prelu(mm(h, q["w2"]) + q["b2"], q["g2"], q["be2"])

    xf = jnp.concatenate(list(feats_dict.values()), axis=1)
    xl = jnp.concatenate(list(layer_feats_dict.values()), axis=1)
    tgt = feats_dict[tgt_key]
    hf = proj(xf, kp["feat_proj"])
    hl = proj(xl, kp["label_proj"])
    hp = kp["head"]
    x = mm(hf, hp["w_cat_f"]) + mm(hl, hp["w_cat_l"]) + hp["b_cat"] + mm(tgt, hp["w_res"])
    x = prelu(x)
    h = mm(prelu(mm(x, hp["w_lr1"])), hp["w_lr2"])
    l = prelu(mm(label_emb, hp["w_lf1"]))
    l = prelu(mm(l, hp["w_lf2"]))
    l = mm(l, hp["w_lf3"]) + hp["b_lf3"]
    return (h + l)[:, :kp["nclass"]]


def ref_forward_f32(feats_dict, layer_feats_dict, label_emb, params, tgt_key):
    def proj(x_bcm, p):                                   # x: (B, C, M)
        def block(h, w, b, lw, lb):
            h = jnp.einsum("bcm,cmn->bcn", h, w) + b[None]
            mean = h.mean(axis=(1, 2), keepdims=True)
            var = ((h - mean) ** 2).mean(axis=(1, 2), keepdims=True)
            h = (h - mean) / jnp.sqrt(var + LN_EPS) * lw[None] + lb[None]
            return jnp.where(h > 0, h, PRELU_ALPHA * h)
        h = block(x_bcm, p["w1"], p["b1"], p["ln1_w"], p["ln1_b"])
        return block(h, p["w2"], p["b2"], p["ln2_w"], p["ln2_b"])

    prelu = lambda v: jnp.where(v > 0, v, PRELU_ALPHA * v)
    tgt = feats_dict[tgt_key]
    B = tgt.shape[0]
    x = proj(jnp.stack(list(feats_dict.values()), axis=1), params["feat_proj"])
    lx = proj(jnp.stack(list(layer_feats_dict.values()), axis=1), params["label_proj"])
    x = jnp.concatenate([x, lx], axis=1).reshape(B, -1)
    p = params["head"]
    x = x @ p["w_cat"] + p["b_cat"] + tgt @ p["w_res"]
    x = prelu(x)
    h = prelu((x @ p["w_lr1"]) * BN_SCALE)
    h = (h @ p["w_lr2"]) * BN_SCALE
    l = prelu((label_emb @ p["w_lf1"]) * BN_SCALE)
    l = prelu((l @ p["w_lf2"]) * BN_SCALE)
    l = l @ p["w_lf3"] + p["b_lf3"]
    return h + l


# ---------------------------------------------------------------------------
# Deterministic parameter init (mirrors shapes from __init__ / reset_parameters)
# ---------------------------------------------------------------------------
def xavier(key, shape, fan_in, fan_out, gain=math.sqrt(2.0)):
    a = gain * math.sqrt(2.0 / (fan_in + fan_out)) * math.sqrt(3.0)
    return jax.random.uniform(key, shape, jnp.float32, -a, a)


def init_params(key, nfeat, hidden, nclass, num_feats, num_label_feats):
    ks = iter(jax.random.split(key, 32))

    def proj_params(C, cin):
        return {
            "w1": xavier(next(ks), (C, cin, hidden), cin, hidden),
            "b1": jnp.zeros((C, hidden), jnp.float32),
            "ln1_w": jnp.ones((C, hidden), jnp.float32),
            "ln1_b": jnp.zeros((C, hidden), jnp.float32),
            "w2": xavier(next(ks), (C, hidden, hidden), hidden, hidden),
            "b2": jnp.zeros((C, hidden), jnp.float32),
            "ln2_w": jnp.ones((C, hidden), jnp.float32),
            "ln2_b": jnp.zeros((C, hidden), jnp.float32),
        }

    K = (num_feats + num_label_feats) * hidden
    head_p = {
        "w_cat": xavier(next(ks), (K, hidden), K, hidden),
        "b_cat": jnp.zeros((1, hidden), jnp.float32),
        "w_res": xavier(next(ks), (nfeat, hidden), nfeat, hidden),
        "w_lr1": xavier(next(ks), (hidden, hidden), hidden, hidden),
        "w_lr2": xavier(next(ks), (hidden, nclass), hidden, nclass),
        "w_lf1": xavier(next(ks), (nclass, hidden), nclass, hidden),
        "w_lf2": xavier(next(ks), (hidden, hidden), hidden, hidden),
        "w_lf3": xavier(next(ks), (hidden, nclass), hidden, nclass),
        "b_lf3": jnp.zeros((1, nclass), jnp.float32),
    }
    return {
        "feat_proj": proj_params(num_feats, nfeat),
        "label_proj": proj_params(num_label_feats, nclass),
        "head": head_p,
    }


if __name__ == "__main__":
    B, nfeat, hidden, nclass = 16, 32, 32, 8
    num_feats, num_label_feats = 4, 2
    tgt_key = "P"

    key = jax.random.PRNGKey(0)
    k_params, k_data = jax.random.split(key)
    module_params = init_params(k_params, nfeat, hidden, nclass, num_feats, num_label_feats)
    kernel_params = prepare_params(module_params, nclass)

    dkeys = iter(jax.random.split(k_data, 16))
    feats_dict = {k: jax.random.normal(next(dkeys), (B, nfeat), jnp.float32)
                  for k in ["P", "P-A", "P-F", "P-P"]}
    layer_feats_dict = {k: jax.random.normal(next(dkeys), (B, nclass), jnp.float32)
                        for k in ["P-A-P", "P-P-P"]}
    label_emb = jax.random.normal(next(dkeys), (B, nclass), jnp.float32)

    out = adaptive_hgnn_mag_forward(feats_dict, layer_feats_dict, label_emb,
                                    kernel_params, tgt_key)
    out = jax.block_until_ready(out)
    assert out.shape == (B, nclass), out.shape

    # tight check vs an exact pure-JAX replica of the kernel math (same bf16 MXU inputs)
    ref_b = ref_forward_packed(feats_dict, layer_feats_dict, label_emb, kernel_params, tgt_key)
    # module-semantics f32 reference; looser tolerance accounts for bf16 MXU operands
    ref_f = ref_forward_f32(feats_dict, layer_feats_dict, label_emb, module_params, tgt_key)

    err_b = float(jnp.max(jnp.abs(out - ref_b)))
    err_f = float(jnp.max(jnp.abs(out - ref_f)))
    assert jnp.allclose(out, ref_b, rtol=2e-3, atol=2e-3), err_b
    assert jnp.allclose(out, ref_f, rtol=5e-2, atol=8e-2), err_f
    print("KERNEL_OK")
</pallas_src>

<mosaic_0001>
module attributes {stable_mosaic.version = 11 : i64} {
  func.func @fused_forward_kernel(%arg0: i32, %arg1: memref<16x128xbf16, #tpu.memory_space<vmem>>, %arg2: memref<16x16xbf16, #tpu.memory_space<vmem>>, %arg3: memref<16x32xbf16, #tpu.memory_space<vmem>>, %arg4: memref<16x8xbf16, #tpu.memory_space<vmem>>, %arg5: memref<128x128xbf16, #tpu.memory_space<vmem>>, %arg6: memref<1x128xf32, #tpu.memory_space<vmem>>, %arg7: memref<1x128xf32, #tpu.memory_space<vmem>>, %arg8: memref<1x128xf32, #tpu.memory_space<vmem>>, %arg9: memref<128x128xbf16, #tpu.memory_space<vmem>>, %arg10: memref<1x128xf32, #tpu.memory_space<vmem>>, %arg11: memref<1x128xf32, #tpu.memory_space<vmem>>, %arg12: memref<1x128xf32, #tpu.memory_space<vmem>>, %arg13: memref<16x64xbf16, #tpu.memory_space<vmem>>, %arg14: memref<1x64xf32, #tpu.memory_space<vmem>>, %arg15: memref<1x64xf32, #tpu.memory_space<vmem>>, %arg16: memref<1x64xf32, #tpu.memory_space<vmem>>, %arg17: memref<64x64xbf16, #tpu.memory_space<vmem>>, %arg18: memref<1x64xf32, #tpu.memory_space<vmem>>, %arg19: memref<1x64xf32, #tpu.memory_space<vmem>>, %arg20: memref<1x64xf32, #tpu.memory_space<vmem>>, %arg21: memref<128x32xbf16, #tpu.memory_space<vmem>>, %arg22: memref<64x32xbf16, #tpu.memory_space<vmem>>, %arg23: memref<1x32xf32, #tpu.memory_space<vmem>>, %arg24: memref<32x32xbf16, #tpu.memory_space<vmem>>, %arg25: memref<32x32xbf16, #tpu.memory_space<vmem>>, %arg26: memref<32x128xbf16, #tpu.memory_space<vmem>>, %arg27: memref<8x32xbf16, #tpu.memory_space<vmem>>, %arg28: memref<32x32xbf16, #tpu.memory_space<vmem>>, %arg29: memref<32x128xbf16, #tpu.memory_space<vmem>>, %arg30: memref<1x128xf32, #tpu.memory_space<vmem>>, %arg31: memref<16x128xf32, #tpu.memory_space<vmem>>) attributes {dimension_semantics = [#tpu.dimension_semantics<parallel>], iteration_bounds = array<i64: 1>, scalar_prefetch = 0 : i64, scratch_operands = 0 : i64, tpu.core_type = #tpu.core_type<tc>, window_params = [{transform_indices = @transform_0, window_bounds = array<i64: 16, 128>}, {transform_indices = @transform_1, window_bounds = array<i64: 16, 16>}, {transform_indices = @transform_2, window_bounds = array<i64: 16, 32>}, {transform_indices = @transform_3, window_bounds = array<i64: 16, 8>}, {pipeline_mode = #tpu.pipeline_mode<synchronous>, transform_indices = @transform_4, window_bounds = array<i64: 128, 128>}, {pipeline_mode = #tpu.pipeline_mode<synchronous>, transform_indices = @transform_5, window_bounds = array<i64: 1, 128>}, {pipeline_mode = #tpu.pipeline_mode<synchronous>, transform_indices = @transform_6, window_bounds = array<i64: 1, 128>}, {pipeline_mode = #tpu.pipeline_mode<synchronous>, transform_indices = @transform_7, window_bounds = array<i64: 1, 128>}, {pipeline_mode = #tpu.pipeline_mode<synchronous>, transform_indices = @transform_8, window_bounds = array<i64: 128, 128>}, {pipeline_mode = #tpu.pipeline_mode<synchronous>, transform_indices = @transform_9, window_bounds = array<i64: 1, 128>}, {pipeline_mode = #tpu.pipeline_mode<synchronous>, transform_indices = @transform_10, window_bounds = array<i64: 1, 128>}, {pipeline_mode = #tpu.pipeline_mode<synchronous>, transform_indices = @transform_11, window_bounds = array<i64: 1, 128>}, {pipeline_mode = #tpu.pipeline_mode<synchronous>, transform_indices = @transform_12, window_bounds = array<i64: 16, 64>}, {pipeline_mode = #tpu.pipeline_mode<synchronous>, transform_indices = @transform_13, window_bounds = array<i64: 1, 64>}, {pipeline_mode = #tpu.pipeline_mode<synchronous>, transform_indices = @transform_14, window_bounds = array<i64: 1, 64>}, {pipeline_mode = #tpu.pipeline_mode<synchronous>, transform_indices = @transform_15, window_bounds = array<i64: 1, 64>}, {pipeline_mode = #tpu.pipeline_mode<synchronous>, transform_indices = @transform_16, window_bounds = array<i64: 64, 64>}, {pipeline_mode = #tpu.pipeline_mode<synchronous>, transform_indices = @transform_17, window_bounds = array<i64: 1, 64>}, {pipeline_mode = #tpu.pipeline_mode<synchronous>, transform_indices = @transform_18, window_bounds = array<i64: 1, 64>}, {pipeline_mode = #tpu.pipeline_mode<synchronous>, transform_indices = @transform_19, window_bounds = array<i64: 1, 64>}, {pipeline_mode = #tpu.pipeline_mode<synchronous>, transform_indices = @transform_20, window_bounds = array<i64: 128, 32>}, {pipeline_mode = #tpu.pipeline_mode<synchronous>, transform_indices = @transform_21, window_bounds = array<i64: 64, 32>}, {pipeline_mode = #tpu.pipeline_mode<synchronous>, transform_indices = @transform_22, window_bounds = array<i64: 1, 32>}, {pipeline_mode = #tpu.pipeline_mode<synchronous>, transform_indices = @transform_23, window_bounds = array<i64: 32, 32>}, {pipeline_mode = #tpu.pipeline_mode<synchronous>, transform_indices = @transform_24, window_bounds = array<i64: 32, 32>}, {pipeline_mode = #tpu.pipeline_mode<synchronous>, transform_indices = @transform_25, window_bounds = array<i64: 32, 128>}, {pipeline_mode = #tpu.pipeline_mode<synchronous>, transform_indices = @transform_26, window_bounds = array<i64: 8, 32>}, {pipeline_mode = #tpu.pipeline_mode<synchronous>, transform_indices = @transform_27, window_bounds = array<i64: 32, 32>}, {pipeline_mode = #tpu.pipeline_mode<synchronous>, transform_indices = @transform_28, window_bounds = array<i64: 32, 128>}, {pipeline_mode = #tpu.pipeline_mode<synchronous>, transform_indices = @transform_29, window_bounds = array<i64: 1, 128>}, {transform_indices = @transform_30, window_bounds = array<i64: 16, 128>}]} {
    %c0 = arith.constant 0 : index
    %c0_0 = arith.constant 0 : index
    %0 = vector.load %arg1[%c0, %c0_0] : memref<16x128xbf16, #tpu.memory_space<vmem>>, vector<16x128xbf16>
    %c0_1 = arith.constant 0 : index
    %c0_2 = arith.constant 0 : index
    %1 = vector.load %arg5[%c0_1, %c0_2] : memref<128x128xbf16, #tpu.memory_space<vmem>>, vector<128x128xbf16>
    %cst = arith.constant dense<0.000000e+00> : vector<16x128xf32>
    %2 = tpu.matmul %0, %1, %cst {dimension_numbers = #tpu.dot_dimension_numbers<[1], [0], [0], [1], [0, 0, 1, 1], [], []>} : vector<16x128xbf16>, vector<128x128xbf16>, vector<16x128xf32> -> vector<16x128xf32>
    %c0_3 = arith.constant 0 : index
    %c0_4 = arith.constant 0 : index
    %3 = vector.load %arg6[%c0_3, %c0_4] : memref<1x128xf32, #tpu.memory_space<vmem>>, vector<1x128xf32>
    %4 = vector.broadcast %3 : vector<1x128xf32> to vector<16x128xf32>
    %5 = arith.addf %2, %4 : vector<16x128xf32>
    %cst_5 = arith.constant dense<0.000000e+00> : vector<16xf32>
    %6 = vector.multi_reduction <add>, %5, %cst_5 [1] : vector<16x128xf32> to vector<16xf32>
    %7 = vector.shape_cast %6 : vector<16xf32> to vector<16x1xf32>
    %cst_6 = arith.constant 1.280000e+02 : f32
    %8 = vector.broadcast %cst_6 : f32 to vector<16x1xf32>
    %9 = arith.divf %7, %8 : vector<16x1xf32>
    %10 = vector.broadcast %9 : vector<16x1xf32> to vector<16x128xf32>
    %11 = arith.subf %5, %10 : vector<16x128xf32>
    %12 = arith.mulf %11, %11 : vector<16x128xf32>
    %cst_7 = arith.constant dense<0.000000e+00> : vector<16xf32>
    %13 = vector.multi_reduction <add>, %12, %cst_7 [1] : vector<16x128xf32> to vector<16xf32>
    %14 = vector.shape_cast %13 : vector<16xf32> to vector<16x1xf32>
    %cst_8 = arith.constant 1.280000e+02 : f32
    %15 = vector.broadcast %cst_8 : f32 to vector<16x1xf32>
    %16 = arith.divf %14, %15 : vector<16x1xf32>
    %cst_9 = arith.constant 9.99999974E-6 : f32
    %17 = vector.broadcast %cst_9 : f32 to vector<16x1xf32>
    %18 = arith.addf %16, %17 : vector<16x1xf32>
    %19 = math.rsqrt %18 : vector<16x1xf32>
    %20 = vector.broadcast %19 : vector<16x1xf32> to vector<16x128xf32>
    %21 = arith.mulf %11, %20 : vector<16x128xf32>
    %c0_10 = arith.constant 0 : index
    %c0_11 = arith.constant 0 : index
    %22 = vector.load %arg7[%c0_10, %c0_11] : memref<1x128xf32, #tpu.memory_space<vmem>>, vector<1x128xf32>
    %23 = vector.broadcast %22 : vector<1x128xf32> to vector<16x128xf32>
    %24 = arith.mulf %21, %23 : vector<16x128xf32>
    %c0_12 = arith.constant 0 : index
    %c0_13 = arith.constant 0 : index
    %25 = vector.load %arg8[%c0_12, %c0_13] : memref<1x128xf32, #tpu.memory_space<vmem>>, vector<1x128xf32>
    %26 = vector.broadcast %25 : vector<1x128xf32> to vector<16x128xf32>
    %27 = arith.addf %24, %26 : vector<16x128xf32>
    %cst_14 = arith.constant 0.000000e+00 : f32
    %28 = vector.broadcast %cst_14 : f32 to vector<16x128xf32>
    %29 = arith.cmpf ogt, %27, %28 : vector<16x128xf32>
    %cst_15 = arith.constant 2.500000e-01 : f32
    %30 = vector.broadcast %cst_15 : f32 to vector<16x128xf32>
    %31 = arith.mulf %30, %27 : vector<16x128xf32>
    %32 = arith.select %29, %27, %31 : vector<16x128xi1>, vector<16x128xf32>
    %33 = arith.truncf %32 : vector<16x128xf32> to vector<16x128xbf16>
    %c0_16 = arith.constant 0 : index
    %c0_17 = arith.constant 0 : index
    %34 = vector.load %arg9[%c0_16, %c0_17] : memref<128x128xbf16, #tpu.memory_space<vmem>>, vector<128x128xbf16>
    %cst_18 = arith.constant dense<0.000000e+00> : vector<16x128xf32>
    %35 = tpu.matmul %33, %34, %cst_18 {dimension_numbers = #tpu.dot_dimension_numbers<[1], [0], [0], [1], [0, 0, 1, 1], [], []>} : vector<16x128xbf16>, vector<128x128xbf16>, vector<16x128xf32> -> vector<16x128xf32>
    %c0_19 = arith.constant 0 : index
    %c0_20 = arith.constant 0 : index
    %36 = vector.load %arg10[%c0_19, %c0_20] : memref<1x128xf32, #tpu.memory_space<vmem>>, vector<1x128xf32>
    %37 = vector.broadcast %36 : vector<1x128xf32> to vector<16x128xf32>
    %38 = arith.addf %35, %37 : vector<16x128xf32>
    %cst_21 = arith.constant dense<0.000000e+00> : vector<16xf32>
    %39 = vector.multi_reduction <add>, %38, %cst_21 [1] : vector<16x128xf32> to vector<16xf32>
    %40 = vector.shape_cast %39 : vector<16xf32> to vector<16x1xf32>
    %cst_22 = arith.constant 1.280000e+02 : f32
    %41 = vector.broadcast %cst_22 : f32 to vector<16x1xf32>
    %42 = arith.divf %40, %41 : vector<16x1xf32>
    %43 = vector.broadcast %42 : vector<16x1xf32> to vector<16x128xf32>
    %44 = arith.subf %38, %43 : vector<16x128xf32>
    %45 = arith.mulf %44, %44 : vector<16x128xf32>
    %cst_23 = arith.constant dense<0.000000e+00> : vector<16xf32>
    %46 = vector.multi_reduction <add>, %45, %cst_23 [1] : vector<16x128xf32> to vector<16xf32>
    %47 = vector.shape_cast %46 : vector<16xf32> to vector<16x1xf32>
    %cst_24 = arith.constant 1.280000e+02 : f32
    %48 = vector.broadcast %cst_24 : f32 to vector<16x1xf32>
    %49 = arith.divf %47, %48 : vector<16x1xf32>
    %cst_25 = arith.constant 9.99999974E-6 : f32
    %50 = vector.broadcast %cst_25 : f32 to vector<16x1xf32>
    %51 = arith.addf %49, %50 : vector<16x1xf32>
    %52 = math.rsqrt %51 : vector<16x1xf32>
    %53 = vector.broadcast %52 : vector<16x1xf32> to vector<16x128xf32>
    %54 = arith.mulf %44, %53 : vector<16x128xf32>
    %c0_26 = arith.constant 0 : index
    %c0_27 = arith.constant 0 : index
    %55 = vector.load %arg11[%c0_26, %c0_27] : memref<1x128xf32, #tpu.memory_space<vmem>>, vector<1x128xf32>
    %56 = vector.broadcast %55 : vector<1x128xf32> to vector<16x128xf32>
    %57 = arith.mulf %54, %56 : vector<16x128xf32>
    %c0_28 = arith.constant 0 : index
    %c0_29 = arith.constant 0 : index
    %58 = vector.load %arg12[%c0_28, %c0_29] : memref<1x128xf32, #tpu.memory_space<vmem>>, vector<1x128xf32>
    %59 = vector.broadcast %58 : vector<1x128xf32> to vector<16x128xf32>
    %60 = arith.addf %57, %59 : vector<16x128xf32>
    %cst_30 = arith.constant 0.000000e+00 : f32
    %61 = vector.broadcast %cst_30 : f32 to vector<16x128xf32>
    %62 = arith.cmpf ogt, %60, %61 : vector<16x128xf32>
    %cst_31 = arith.constant 2.500000e-01 : f32
    %63 = vector.broadcast %cst_31 : f32 to vector<16x128xf32>
    %64 = arith.mulf %63, %60 : vector<16x128xf32>
    %65 = arith.select %62, %60, %64 : vector<16x128xi1>, vector<16x128xf32>
    %c0_32 = arith.constant 0 : index
    %c0_33 = arith.constant 0 : index
    %66 = vector.load %arg2[%c0_32, %c0_33] : memref<16x16xbf16, #tpu.memory_space<vmem>>, vector<16x16xbf16>
    %c0_34 = arith.constant 0 : index
    %c0_35 = arith.constant 0 : index
    %67 = vector.load %arg13[%c0_34, %c0_35] : memref<16x64xbf16, #tpu.memory_space<vmem>>, vector<16x64xbf16>
    %cst_36 = arith.constant dense<0.000000e+00> : vector<16x64xf32>
    %68 = tpu.matmul %66, %67, %cst_36 {dimension_numbers = #tpu.dot_dimension_numbers<[1], [0], [0], [1], [0, 0, 1, 1], [], []>} : vector<16x16xbf16>, vector<16x64xbf16>, vector<16x64xf32> -> vector<16x64xf32>
    %c0_37 = arith.constant 0 : index
    %c0_38 = arith.constant 0 : index
    %69 = vector.load %arg14[%c0_37, %c0_38] : memref<1x64xf32, #tpu.memory_space<vmem>>, vector<1x64xf32>
    %70 = vector.broadcast %69 : vector<1x64xf32> to vector<16x64xf32>
    %71 = arith.addf %68, %70 : vector<16x64xf32>
    %cst_39 = arith.constant dense<0.000000e+00> : vector<16xf32>
    %72 = vector.multi_reduction <add>, %71, %cst_39 [1] : vector<16x64xf32> to vector<16xf32>
    %73 = vector.shape_cast %72 : vector<16xf32> to vector<16x1xf32>
    %cst_40 = arith.constant 6.400000e+01 : f32
    %74 = vector.broadcast %cst_40 : f32 to vector<16x1xf32>
    %75 = arith.divf %73, %74 : vector<16x1xf32>
    %76 = vector.broadcast %75 : vector<16x1xf32> to vector<16x64xf32>
    %77 = arith.subf %71, %76 : vector<16x64xf32>
    %78 = arith.mulf %77, %77 : vector<16x64xf32>
    %cst_41 = arith.constant dense<0.000000e+00> : vector<16xf32>
    %79 = vector.multi_reduction <add>, %78, %cst_41 [1] : vector<16x64xf32> to vector<16xf32>
    %80 = vector.shape_cast %79 : vector<16xf32> to vector<16x1xf32>
    %cst_42 = arith.constant 6.400000e+01 : f32
    %81 = vector.broadcast %cst_42 : f32 to vector<16x1xf32>
    %82 = arith.divf %80, %81 : vector<16x1xf32>
    %cst_43 = arith.constant 9.99999974E-6 : f32
    %83 = vector.broadcast %cst_43 : f32 to vector<16x1xf32>
    %84 = arith.addf %82, %83 : vector<16x1xf32>
    %85 = math.rsqrt %84 : vector<16x1xf32>
    %86 = vector.broadcast %85 : vector<16x1xf32> to vector<16x64xf32>
    %87 = arith.mulf %77, %86 : vector<16x64xf32>
    %c0_44 = arith.constant 0 : index
    %c0_45 = arith.constant 0 : index
    %88 = vector.load %arg15[%c0_44, %c0_45] : memref<1x64xf32, #tpu.memory_space<vmem>>, vector<1x64xf32>
    %89 = vector.broadcast %88 : vector<1x64xf32> to vector<16x64xf32>
    %90 = arith.mulf %87, %89 : vector<16x64xf32>
    %c0_46 = arith.constant 0 : index
    %c0_47 = arith.constant 0 : index
    %91 = vector.load %arg16[%c0_46, %c0_47] : memref<1x64xf32, #tpu.memory_space<vmem>>, vector<1x64xf32>
    %92 = vector.broadcast %91 : vector<1x64xf32> to vector<16x64xf32>
    %93 = arith.addf %90, %92 : vector<16x64xf32>
    %cst_48 = arith.constant 0.000000e+00 : f32
    %94 = vector.broadcast %cst_48 : f32 to vector<16x64xf32>
    %95 = arith.cmpf ogt, %93, %94 : vector<16x64xf32>
    %cst_49 = arith.constant 2.500000e-01 : f32
    %96 = vector.broadcast %cst_49 : f32 to vector<16x64xf32>
    %97 = arith.mulf %96, %93 : vector<16x64xf32>
    %98 = arith.select %95, %93, %97 : vector<16x64xi1>, vector<16x64xf32>
    %99 = arith.truncf %98 : vector<16x64xf32> to vector<16x64xbf16>
    %c0_50 = arith.constant 0 : index
    %c0_51 = arith.constant 0 : index
    %100 = vector.load %arg17[%c0_50, %c0_51] : memref<64x64xbf16, #tpu.memory_space<vmem>>, vector<64x64xbf16>
    %cst_52 = arith.constant dense<0.000000e+00> : vector<16x64xf32>
    %101 = tpu.matmul %99, %100, %cst_52 {dimension_numbers = #tpu.dot_dimension_numbers<[1], [0], [0], [1], [0, 0, 1, 1], [], []>} : vector<16x64xbf16>, vector<64x64xbf16>, vector<16x64xf32> -> vector<16x64xf32>
    %c0_53 = arith.constant 0 : index
    %c0_54 = arith.constant 0 : index
    %102 = vector.load %arg18[%c0_53, %c0_54] : memref<1x64xf32, #tpu.memory_space<vmem>>, vector<1x64xf32>
    %103 = vector.broadcast %102 : vector<1x64xf32> to vector<16x64xf32>
    %104 = arith.addf %101, %103 : vector<16x64xf32>
    %cst_55 = arith.constant dense<0.000000e+00> : vector<16xf32>
    %105 = vector.multi_reduction <add>, %104, %cst_55 [1] : vector<16x64xf32> to vector<16xf32>
    %106 = vector.shape_cast %105 : vector<16xf32> to vector<16x1xf32>
    %cst_56 = arith.constant 6.400000e+01 : f32
    %107 = vector.broadcast %cst_56 : f32 to vector<16x1xf32>
    %108 = arith.divf %106, %107 : vector<16x1xf32>
    %109 = vector.broadcast %108 : vector<16x1xf32> to vector<16x64xf32>
    %110 = arith.subf %104, %109 : vector<16x64xf32>
    %111 = arith.mulf %110, %110 : vector<16x64xf32>
    %cst_57 = arith.constant dense<0.000000e+00> : vector<16xf32>
    %112 = vector.multi_reduction <add>, %111, %cst_57 [1] : vector<16x64xf32> to vector<16xf32>
    %113 = vector.shape_cast %112 : vector<16xf32> to vector<16x1xf32>
    %cst_58 = arith.constant 6.400000e+01 : f32
    %114 = vector.broadcast %cst_58 : f32 to vector<16x1xf32>
    %115 = arith.divf %113, %114 : vector<16x1xf32>
    %cst_59 = arith.constant 9.99999974E-6 : f32
    %116 = vector.broadcast %cst_59 : f32 to vector<16x1xf32>
    %117 = arith.addf %115, %116 : vector<16x1xf32>
    %118 = math.rsqrt %117 : vector<16x1xf32>
    %119 = vector.broadcast %118 : vector<16x1xf32> to vector<16x64xf32>
    %120 = arith.mulf %110, %119 : vector<16x64xf32>
    %c0_60 = arith.constant 0 : index
    %c0_61 = arith.constant 0 : index
    %121 = vector.load %arg19[%c0_60, %c0_61] : memref<1x64xf32, #tpu.memory_space<vmem>>, vector<1x64xf32>
    %122 = vector.broadcast %121 : vector<1x64xf32> to vector<16x64xf32>
    %123 = arith.mulf %120, %122 : vector<16x64xf32>
    %c0_62 = arith.constant 0 : index
    %c0_63 = arith.constant 0 : index
    %124 = vector.load %arg20[%c0_62, %c0_63] : memref<1x64xf32, #tpu.memory_space<vmem>>, vector<1x64xf32>
    %125 = vector.broadcast %124 : vector<1x64xf32> to vector<16x64xf32>
    %126 = arith.addf %123, %125 : vector<16x64xf32>
    %cst_64 = arith.constant 0.000000e+00 : f32
    %127 = vector.broadcast %cst_64 : f32 to vector<16x64xf32>
    %128 = arith.cmpf ogt, %126, %127 : vector<16x64xf32>
    %cst_65 = arith.constant 2.500000e-01 : f32
    %129 = vector.broadcast %cst_65 : f32 to vector<16x64xf32>
    %130 = arith.mulf %129, %126 : vector<16x64xf32>
    %131 = arith.select %128, %126, %130 : vector<16x64xi1>, vector<16x64xf32>
    %132 = arith.truncf %65 : vector<16x128xf32> to vector<16x128xbf16>
    %c0_66 = arith.constant 0 : index
    %c0_67 = arith.constant 0 : index
    %133 = vector.load %arg21[%c0_66, %c0_67] : memref<128x32xbf16, #tpu.memory_space<vmem>>, vector<128x32xbf16>
    %cst_68 = arith.constant dense<0.000000e+00> : vector<16x32xf32>
    %134 = tpu.matmul %132, %133, %cst_68 {dimension_numbers = #tpu.dot_dimension_numbers<[1], [0], [0], [1], [0, 0, 1, 1], [], []>} : vector<16x128xbf16>, vector<128x32xbf16>, vector<16x32xf32> -> vector<16x32xf32>
    %135 = arith.truncf %131 : vector<16x64xf32> to vector<16x64xbf16>
    %c0_69 = arith.constant 0 : index
    %c0_70 = arith.constant 0 : index
    %136 = vector.load %arg22[%c0_69, %c0_70] : memref<64x32xbf16, #tpu.memory_space<vmem>>, vector<64x32xbf16>
    %cst_71 = arith.constant dense<0.000000e+00> : vector<16x32xf32>
    %137 = tpu.matmul %135, %136, %cst_71 {dimension_numbers = #tpu.dot_dimension_numbers<[1], [0], [0], [1], [0, 0, 1, 1], [], []>} : vector<16x64xbf16>, vector<64x32xbf16>, vector<16x32xf32> -> vector<16x32xf32>
    %138 = arith.addf %134, %137 : vector<16x32xf32>
    %c0_72 = arith.constant 0 : index
    %c0_73 = arith.constant 0 : index
    %139 = vector.load %arg23[%c0_72, %c0_73] : memref<1x32xf32, #tpu.memory_space<vmem>>, vector<1x32xf32>
    %140 = vector.broadcast %139 : vector<1x32xf32> to vector<16x32xf32>
    %141 = arith.addf %138, %140 : vector<16x32xf32>
    %c0_74 = arith.constant 0 : index
    %c0_75 = arith.constant 0 : index
    %142 = vector.load %arg3[%c0_74, %c0_75] : memref<16x32xbf16, #tpu.memory_space<vmem>>, vector<16x32xbf16>
    %c0_76 = arith.constant 0 : index
    %c0_77 = arith.constant 0 : index
    %143 = vector.load %arg24[%c0_76, %c0_77] : memref<32x32xbf16, #tpu.memory_space<vmem>>, vector<32x32xbf16>
    %cst_78 = arith.constant dense<0.000000e+00> : vector<16x32xf32>
    %144 = tpu.matmul %142, %143, %cst_78 {dimension_numbers = #tpu.dot_dimension_numbers<[1], [0], [0], [1], [0, 0, 1, 1], [], []>} : vector<16x32xbf16>, vector<32x32xbf16>, vector<16x32xf32> -> vector<16x32xf32>
    %145 = arith.addf %141, %144 : vector<16x32xf32>
    %cst_79 = arith.constant 0.000000e+00 : f32
    %146 = vector.broadcast %cst_79 : f32 to vector<16x32xf32>
    %147 = arith.cmpf ogt, %145, %146 : vector<16x32xf32>
    %cst_80 = arith.constant 2.500000e-01 : f32
    %148 = vector.broadcast %cst_80 : f32 to vector<16x32xf32>
    %149 = arith.mulf %148, %145 : vector<16x32xf32>
    %150 = arith.select %147, %145, %149 : vector<16x32xi1>, vector<16x32xf32>
    %151 = arith.truncf %150 : vector<16x32xf32> to vector<16x32xbf16>
    %c0_81 = arith.constant 0 : index
    %c0_82 = arith.constant 0 : index
    %152 = vector.load %arg25[%c0_81, %c0_82] : memref<32x32xbf16, #tpu.memory_space<vmem>>, vector<32x32xbf16>
    %cst_83 = arith.constant dense<0.000000e+00> : vector<16x32xf32>
    %153 = tpu.matmul %151, %152, %cst_83 {dimension_numbers = #tpu.dot_dimension_numbers<[1], [0], [0], [1], [0, 0, 1, 1], [], []>} : vector<16x32xbf16>, vector<32x32xbf16>, vector<16x32xf32> -> vector<16x32xf32>
    %cst_84 = arith.constant 0.000000e+00 : f32
    %154 = vector.broadcast %cst_84 : f32 to vector<16x32xf32>
    %155 = arith.cmpf ogt, %153, %154 : vector<16x32xf32>
    %cst_85 = arith.constant 2.500000e-01 : f32
    %156 = vector.broadcast %cst_85 : f32 to vector<16x32xf32>
    %157 = arith.mulf %156, %153 : vector<16x32xf32>
    %158 = arith.select %155, %153, %157 : vector<16x32xi1>, vector<16x32xf32>
    %159 = arith.truncf %158 : vector<16x32xf32> to vector<16x32xbf16>
    %c0_86 = arith.constant 0 : index
    %c0_87 = arith.constant 0 : index
    %160 = vector.load %arg26[%c0_86, %c0_87] : memref<32x128xbf16, #tpu.memory_space<vmem>>, vector<32x128xbf16>
    %cst_88 = arith.constant dense<0.000000e+00> : vector<16x128xf32>
    %161 = tpu.matmul %159, %160, %cst_88 {dimension_numbers = #tpu.dot_dimension_numbers<[1], [0], [0], [1], [0, 0, 1, 1], [], []>} : vector<16x32xbf16>, vector<32x128xbf16>, vector<16x128xf32> -> vector<16x128xf32>
    %c0_89 = arith.constant 0 : index
    %c0_90 = arith.constant 0 : index
    %162 = vector.load %arg4[%c0_89, %c0_90] : memref<16x8xbf16, #tpu.memory_space<vmem>>, vector<16x8xbf16>
    %c0_91 = arith.constant 0 : index
    %c0_92 = arith.constant 0 : index
    %163 = vector.load %arg27[%c0_91, %c0_92] : memref<8x32xbf16, #tpu.memory_space<vmem>>, vector<8x32xbf16>
    %cst_93 = arith.constant dense<0.000000e+00> : vector<16x32xf32>
    %164 = tpu.matmul %162, %163, %cst_93 {dimension_numbers = #tpu.dot_dimension_numbers<[1], [0], [0], [1], [0, 0, 1, 1], [], []>} : vector<16x8xbf16>, vector<8x32xbf16>, vector<16x32xf32> -> vector<16x32xf32>
    %cst_94 = arith.constant 0.000000e+00 : f32
    %165 = vector.broadcast %cst_94 : f32 to vector<16x32xf32>
    %166 = arith.cmpf ogt, %164, %165 : vector<16x32xf32>
    %cst_95 = arith.constant 2.500000e-01 : f32
    %167 = vector.broadcast %cst_95 : f32 to vector<16x32xf32>
    %168 = arith.mulf %167, %164 : vector<16x32xf32>
    %169 = arith.select %166, %164, %168 : vector<16x32xi1>, vector<16x32xf32>
    %170 = arith.truncf %169 : vector<16x32xf32> to vector<16x32xbf16>
    %c0_96 = arith.constant 0 : index
    %c0_97 = arith.constant 0 : index
    %171 = vector.load %arg28[%c0_96, %c0_97] : memref<32x32xbf16, #tpu.memory_space<vmem>>, vector<32x32xbf16>
    %cst_98 = arith.constant dense<0.000000e+00> : vector<16x32xf32>
    %172 = tpu.matmul %170, %171, %cst_98 {dimension_numbers = #tpu.dot_dimension_numbers<[1], [0], [0], [1], [0, 0, 1, 1], [], []>} : vector<16x32xbf16>, vector<32x32xbf16>, vector<16x32xf32> -> vector<16x32xf32>
    %cst_99 = arith.constant 0.000000e+00 : f32
    %173 = vector.broadcast %cst_99 : f32 to vector<16x32xf32>
    %174 = arith.cmpf ogt, %172, %173 : vector<16x32xf32>
    %cst_100 = arith.constant 2.500000e-01 : f32
    %175 = vector.broadcast %cst_100 : f32 to vector<16x32xf32>
    %176 = arith.mulf %175, %172 : vector<16x32xf32>
    %177 = arith.select %174, %172, %176 : vector<16x32xi1>, vector<16x32xf32>
    %178 = arith.truncf %177 : vector<16x32xf32> to vector<16x32xbf16>
    %c0_101 = arith.constant 0 : index
    %c0_102 = arith.constant 0 : index
    %179 = vector.load %arg29[%c0_101, %c0_102] : memref<32x128xbf16, #tpu.memory_space<vmem>>, vector<32x128xbf16>
    %cst_103 = arith.constant dense<0.000000e+00> : vector<16x128xf32>
    %180 = tpu.matmul %178, %179, %cst_103 {dimension_numbers = #tpu.dot_dimension_numbers<[1], [0], [0], [1], [0, 0, 1, 1], [], []>} : vector<16x32xbf16>, vector<32x128xbf16>, vector<16x128xf32> -> vector<16x128xf32>
    %c0_104 = arith.constant 0 : index
    %c0_105 = arith.constant 0 : index
    %181 = vector.load %arg30[%c0_104, %c0_105] : memref<1x128xf32, #tpu.memory_space<vmem>>, vector<1x128xf32>
    %182 = vector.broadcast %181 : vector<1x128xf32> to vector<16x128xf32>
    %183 = arith.addf %180, %182 : vector<16x128xf32>
    %184 = arith.addf %161, %183 : vector<16x128xf32>
    %c0_106 = arith.constant 0 : index
    %c0_107 = arith.constant 0 : index
    %185 = vector.load %arg31[%c0_106, %c0_107] : memref<16x128xf32, #tpu.memory_space<vmem>>, vector<16x128xf32>
    tpu.vector_store %arg31[%c0_106, %c0_107], %184 {strides = array<i32>} : memref<16x128xf32, #tpu.memory_space<vmem>>, vector<16x128xf32>,
    return
  }
  func.func @transform_0(%arg0: i32) -> (i32, i32) {
    %c0_i32 = arith.constant 0 : i32
    %c0_i32_0 = arith.constant 0 : i32
    return %arg0, %c0_i32 : i32, i32
  }
  func.func @transform_1(%arg0: i32) -> (i32, i32) {
    %c0_i32 = arith.constant 0 : i32
    %c0_i32_0 = arith.constant 0 : i32
    return %arg0, %c0_i32 : i32, i32
  }
  func.func @transform_2(%arg0: i32) -> (i32, i32) {
    %c0_i32 = arith.constant 0 : i32
    %c0_i32_0 = arith.constant 0 : i32
    return %arg0, %c0_i32 : i32, i32
  }
  func.func @transform_3(%arg0: i32) -> (i32, i32) {
    %c0_i32 = arith.constant 0 : i32
    %c0_i32_0 = arith.constant 0 : i32
    return %arg0, %c0_i32 : i32, i32
  }
  func.func @transform_4(%arg0: i32) -> (i32, i32) {
    %c0_i32 = arith.constant 0 : i32
    %c0_i32_0 = arith.constant 0 : i32
    %c0_i32_1 = arith.constant 0 : i32
    return %c0_i32, %c0_i32_0 : i32, i32
  }
  func.func @transform_5(%arg0: i32) -> (i32, i32) {
    %c0_i32 = arith.constant 0 : i32
    %c0_i32_0 = arith.constant 0 : i32
    %c0_i32_1 = arith.constant 0 : i32
    return %c0_i32, %c0_i32_0 : i32, i32
  }
  func.func @transform_6(%arg0: i32) -> (i32, i32) {
    %c0_i32 = arith.constant 0 : i32
    %c0_i32_0 = arith.constant 0 : i32
    %c0_i32_1 = arith.constant 0 : i32
    return %c0_i32, %c0_i32_0 : i32, i32
  }
  func.func @transform_7(%arg0: i32) -> (i32, i32) {
    %c0_i32 = arith.constant 0 : i32
    %c0_i32_0 = arith.constant 0 : i32
    %c0_i32_1 = arith.constant 0 : i32
    return %c0_i32, %c0_i32_0 : i32, i32
  }
  func.func @transform_8(%arg0: i32) -> (i32, i32) {
    %c0_i32 = arith.constant 0 : i32
    %c0_i32_0 = arith.constant 0 : i32
    %c0_i32_1 = arith.constant 0 : i32
    return %c0_i32, %c0_i32_0 : i32, i32
  }
  func.func @transform_9(%arg0: i32) -> (i32, i32) {
    %c0_i32 = arith.constant 0 : i32
    %c0_i32_0 = arith.constant 0 : i32
    %c0_i32_1 = arith.constant 0 : i32
    return %c0_i32, %c0_i32_0 : i32, i32
  }
  func.func @transform_10(%arg0: i32) -> (i32, i32) {
    %c0_i32 = arith.constant 0 : i32
    %c0_i32_0 = arith.constant 0 : i32
    %c0_i32_1 = arith.constant 0 : i32
    return %c0_i32, %c0_i32_0 : i32, i32
  }
  func.func @transform_11(%arg0: i32) -> (i32, i32) {
    %c0_i32 = arith.constant 0 : i32
    %c0_i32_0 = arith.constant 0 : i32
    %c0_i32_1 = arith.constant 0 : i32
    return %c0_i32, %c0_i32_0 : i32, i32
  }
  func.func @transform_12(%arg0: i32) -> (i32, i32) {
    %c0_i32 = arith.constant 0 : i32
    %c0_i32_0 = arith.constant 0 : i32
    %c0_i32_1 = arith.constant 0 : i32
    return %c0_i32, %c0_i32_0 : i32, i32
  }
  func.func @transform_13(%arg0: i32) -> (i32, i32) {
    %c0_i32 = arith.constant 0 : i32
    %c0_i32_0 = arith.constant 0 : i32
    %c0_i32_1 = arith.constant 0 : i32
    return %c0_i32, %c0_i32_0 : i32, i32
  }
  func.func @transform_14(%arg0: i32) -> (i32, i32) {
    %c0_i32 = arith.constant 0 : i32
    %c0_i32_0 = arith.constant 0 : i32
    %c0_i32_1 = arith.constant 0 : i32
    return %c0_i32, %c0_i32_0 : i32, i32
  }
  func.func @transform_15(%arg0: i32) -> (i32, i32) {
    %c0_i32 = arith.constant 0 : i32
    %c0_i32_0 = arith.constant 0 : i32
    %c0_i32_1 = arith.constant 0 : i32
    return %c0_i32, %c0_i32_0 : i32, i32
  }
  func.func @transform_16(%arg0: i32) -> (i32, i32) {
    %c0_i32 = arith.constant 0 : i32
    %c0_i32_0 = arith.constant 0 : i32
    %c0_i32_1 = arith.constant 0 : i32
    return %c0_i32, %c0_i32_0 : i32, i32
  }
  func.func @transform_17(%arg0: i32) -> (i32, i32) {
    %c0_i32 = arith.constant 0 : i32
    %c0_i32_0 = arith.constant 0 : i32
    %c0_i32_1 = arith.constant 0 : i32
    return %c0_i32, %c0_i32_0 : i32, i32
  }
  func.func @transform_18(%arg0: i32) -> (i32, i32) {
    %c0_i32 = arith.constant 0 : i32
    %c0_i32_0 = arith.constant 0 : i32
    %c0_i32_1 = arith.constant 0 : i32
    return %c0_i32, %c0_i32_0 : i32, i32
  }
  func.func @transform_19(%arg0: i32) -> (i32, i32) {
    %c0_i32 = arith.constant 0 : i32
    %c0_i32_0 = arith.constant 0 : i32
    %c0_i32_1 = arith.constant 0 : i32
    return %c0_i32, %c0_i32_0 : i32, i32
  }
  func.func @transform_20(%arg0: i32) -> (i32, i32) {
    %c0_i32 = arith.constant 0 : i32
    %c0_i32_0 = arith.constant 0 : i32
    %c0_i32_1 = arith.constant 0 : i32
    return %c0_i32, %c0_i32_0 : i32, i32
  }
  func.func @transform_21(%arg0: i32) -> (i32, i32) {
    %c0_i32 = arith.constant 0 : i32
    %c0_i32_0 = arith.constant 0 : i32
    %c0_i32_1 = arith.constant 0 : i32
    return %c0_i32, %c0_i32_0 : i32, i32
  }
  func.func @transform_22(%arg0: i32) -> (i32, i32) {
    %c0_i32 = arith.constant 0 : i32
    %c0_i32_0 = arith.constant 0 : i32
    %c0_i32_1 = arith.constant 0 : i32
    return %c0_i32, %c0_i32_0 : i32, i32
  }
  func.func @transform_23(%arg0: i32) -> (i32, i32) {
    %c0_i32 = arith.constant 0 : i32
    %c0_i32_0 = arith.constant 0 : i32
    %c0_i32_1 = arith.constant 0 : i32
    return %c0_i32, %c0_i32_0 : i32, i32
  }
  func.func @transform_24(%arg0: i32) -> (i32, i32) {
    %c0_i32 = arith.constant 0 : i32
    %c0_i32_0 = arith.constant 0 : i32
    %c0_i32_1 = arith.constant 0 : i32
    return %c0_i32, %c0_i32_0 : i32, i32
  }
  func.func @transform_25(%arg0: i32) -> (i32, i32) {
    %c0_i32 = arith.constant 0 : i32
    %c0_i32_0 = arith.constant 0 : i32
    %c0_i32_1 = arith.constant 0 : i32
    return %c0_i32, %c0_i32_0 : i32, i32
  }
  func.func @transform_26(%arg0: i32) -> (i32, i32) {
    %c0_i32 = arith.constant 0 : i32
    %c0_i32_0 = arith.constant 0 : i32
    %c0_i32_1 = arith.constant 0 : i32
    return %c0_i32, %c0_i32_0 : i32, i32
  }
  func.func @transform_27(%arg0: i32) -> (i32, i32) {
    %c0_i32 = arith.constant 0 : i32
    %c0_i32_0 = arith.constant 0 : i32
    %c0_i32_1 = arith.constant 0 : i32
    return %c0_i32, %c0_i32_0 : i32, i32
  }
  func.func @transform_28(%arg0: i32) -> (i32, i32) {
    %c0_i32 = arith.constant 0 : i32
    %c0_i32_0 = arith.constant 0 : i32
    %c0_i32_1 = arith.constant 0 : i32
    return %c0_i32, %c0_i32_0 : i32, i32
  }
  func.func @transform_29(%arg0: i32) -> (i32, i32) {
    %c0_i32 = arith.constant 0 : i32
    %c0_i32_0 = arith.constant 0 : i32
    %c0_i32_1 = arith.constant 0 : i32
    return %c0_i32, %c0_i32_0 : i32, i32
  }
  func.func @transform_30(%arg0: i32) -> (i32, i32) {
    %c0_i32 = arith.constant 0 : i32
    %c0_i32_0 = arith.constant 0 : i32
    return %arg0, %c0_i32 : i32, i32
  }
}

</mosaic_0001>

<bundles_post_ra>
// kernel: tpu_custom_call.1
= control target key start
LH: loop header
LB: loop body
LE: loop exit
PB: predicated region body
PF: predicated region fallthrough
CT: control target
= control target key end

     0   :  { %s2415_s6 = smov 1   ;;  %s2416_s10 = smov 2   ;;  %s2893_s0 = inlined_call_operand.smem [shape: u32[31], index: -1, kind: input, shape index: {}] }
   0x1   :  { %s2478_s5 = sld [smem:[%s2893_s0]]   ;;  %s2417_s14 = smov 3  }
   0x2   :  { %s2483_s9 = sld [smem:[%s2893_s0 + %s2415_s6]]   ;;  %s2418_s18 = smov 4  }
   0x3   :  { %s2488_s13 = sld [smem:[%s2893_s0 + %s2416_s10]]   ;;  %s2419_s22 = smov 5  }
   0x4   :  { %s2493_s17 = sld [smem:[%s2893_s0 + %s2417_s14]]   ;;  %s2420_s26 = smov 6  }
   0x5   :  { %s2498_s21 = sld [smem:[%s2893_s0 + %s2418_s18]]   ;;  %s2421_s30 = smov 7  }
   0x6   :  { %s2503_s25 = sld [smem:[%s2893_s0 + %s2419_s22]]   ;;  %s2422_s4 = smov 8  }
   0x7   :  { %s2508_s29 = sld [smem:[%s2893_s0 + %s2420_s26]]   ;;  %s2423_s10 = smov 9  }
   0x8   :  { %s2513_s3 = sld [smem:[%s2893_s0 + %s2421_s30]]   ;;  %s2424_s15 = smov 10  }
   0x9   :  { %s2518_s8 = sld [smem:[%s2893_s0 + %s2422_s4]]   ;;  %s2425_s20 = smov 11  }
   0xa   :  { %2904 = sst [smem:[#allocation43_spill]] %s2493_s17  ;;  %s2426_s26 = smov 12  }
   0xb   :  { %2905 = sst [smem:[#allocation44_spill]] %s2498_s21  ;;  %s2427_s1 = smov 13  }
   0xc   :  { %s2523_s14 = sld [smem:[%s2893_s0 + %s2423_s10]]   ;;  %s2428_s7 = smov 14  }
   0xd   :  { %s2528_s19 = sld [smem:[%s2893_s0 + %s2424_s15]]   ;;  %s2429_s15 = smov 15  }
   0xe   :  { %s2533_s24 = sld [smem:[%s2893_s0 + %s2425_s20]]   ;;  %s2430_s22 = smov 16  }
   0xf   :  { %2906 = sst [smem:[#allocation45_spill]] %s2518_s8  ;;  %s2431_s28 = smov 17  }
  0x10   :  { %s2538_s30 = sld [smem:[%s2893_s0 + %s2426_s26]]  }
  0x11   :  { %s2543_s6 = sld [smem:[%s2893_s0 + %s2427_s1]]  }
  0x12   :  { %s2548_s12 = sld [smem:[%s2893_s0 + %s2428_s7]]   ;;  %s2432_s7 = smov 18  }
  0x13   :  { %s2553_s20 = sld [smem:[%s2893_s0 + %s2429_s15]]   ;;  %s2433_s15 = smov 19  }
  0x14   :  { %s2558_s27 = sld [smem:[%s2893_s0 + %s2430_s22]]   ;;  %s2434_s22 = smov 20  }
  0x15   :  { %s2563_s4 = sld [smem:[%s2893_s0 + %s2431_s28]]   ;;  %s2435_s28 = smov 21  }
  0x16   :  { %s2568_s17 = sld [smem:[%s2893_s0 + %s2432_s7]]   ;;  %s2436_s7 = smov 22  }
  0x17   :  { %s2573_s8 = sld [smem:[%s2893_s0 + %s2433_s15]]   ;;  %s2437_s15 = smov 23  }
  0x18   :  { %s2583_s21 = sld [smem:[%s2893_s0 + %s2435_s28]]   ;;  %s2439_s28 = smov 25  }
  0x19   :  { %2907 = sst [smem:[#allocation46_spill]] %s2553_s20 }
  0x1a   :  { %2908 = sst [smem:[#allocation47_spill]] %s2558_s27 }
  0x1b   :  { %s2578_s27 = sld [smem:[%s2893_s0 + %s2434_s22]]   ;;  %s2438_s22 = smov 24  }
  0x1c   :  { %2909 = sst [smem:[#allocation48_spill]] %s2568_s17 }
  0x1d   :  { %2910 = sst [smem:[#allocation49_spill]] %s2573_s8 }
  0x1e   :  { %2912 = sst [smem:[#allocation51_spill]] %s2583_s21 }
  0x1f   :  { %s2588_s17 = sld [smem:[%s2893_s0 + %s2436_s7]]   ;;  %s2440_s7 = smov 26  }
  0x20   :  { %s2593_s8 = sld [smem:[%s2893_s0 + %s2437_s15]]   ;;  %s2441_s15 = smov 27  }
  0x21   :  { %2911 = sst [smem:[#allocation50_spill]] %s2578_s27 }
  0x22   :  { %s2598_s27 = sld [smem:[%s2893_s0 + %s2438_s22]]   ;;  %s2442_s22 = smov 28  }
  0x23   :  { %s2603_s21 = sld [smem:[%s2893_s0 + %s2439_s28]]   ;;  %s2443_s28 = smov 29  }
  0x24   :  { %s2623_s20 = sld [smem:[%s2893_s0 + %s2443_s28]]  }
  0x25   :  { %2913 = sst [smem:[#allocation52_spill]] %s2588_s17 }
  0x26   :  { %2914 = sst [smem:[#allocation53_spill]] %s2593_s8 }
  0x27   :  { %s2608_s17 = sld [smem:[%s2893_s0 + %s2440_s7]]   ;;  %s2444_s7 = smov 30  }
  0x28   :  { %2915 = sst [smem:[#allocation54_spill]] %s2598_s27 }
  0x29   :  { %s2613_s8 = sld [smem:[%s2893_s0 + %s2441_s15]]  }
  0x2a   :  { %s2618_s27 = sld [smem:[%s2893_s0 + %s2442_s22]]  }
  0x2d   :  { %2916 = sst [smem:[#allocation55_spill]] %s2608_s17 }
  0x2e   :  { %s2628_s17 = sld [smem:[%s2893_s0 + %s2444_s7]]  }
  0x2f   :  { %66 = vsyncpa [#allocation3], 0 }
  0x30   :  { %67 = vsyncpa [#allocation6], 0 }
  0x31   :  { %68 = vsyncpa [#allocation9], 0 }
  0x32   :  { %69 = vsyncpa [#allocation12], 0 }
  0x33   :  { %70 = vsyncpa [#allocation15], 0 }
  0x34   :  { %71 = vsyncpa [#allocation18], 0 }
  0x35   :  { %72 = vsyncpa [#allocation21], 0 }
  0x36   :  { %73 = vsyncpa [#allocation24], 0 }
  0x37   :  { %74 = vsyncpa [#allocation27], 0 }
  0x38   :  { %75 = vsyncpa [#allocation30], 0 }
  0x39   :  { %76 = vsyncpa [#allocation4], 0  ;;  %s2445_s15 = smov [#allocation5]   ;;  %s2446_s18 = smov [#allocation8]  }
  0x3a   :  { %s94_s16 = sshll.u32 %s2445_s15, 4  ;;  %s123_s22 = sshll.u32 %s2446_s18, 4  ;;  %s95_s16 = int_to_ptr.vmem [resolvable:$true] %s94_s16  ;;  %s2630_s22 = int_to_ptr.vmem [resolvable:$true] %s123_s22 }
  0x3b   :  { %s1975_s0 = scalar_lea.hbm %s2483_s9, 128 }
  0x3c   :  { %p1976_p0 = scmp.ne.s32.totalorder %s2483_s9, %s1975_s0  ;;  %p1979_p1 = scmp.lt.u32.totalorder %s1975_s0, %s2483_s9 }
  0x3e   :  { %p1981_p2 = pnand %p1979_p1, %p1976_p0 }
  0x40   :  { %1984 = shalt.err (!%p1981_p2)
}
  0x41   :  { %s1985_s23 = scalar_lea.vmem %s95_s16, 128  ;;  %p1990_p4 = scmp.lt.s32.totalorder %s95_s16, %s95_s16 }
  0x42   :  { %p1986_p3 = scmp.ne.s32.totalorder %s95_s16, %s1985_s23  ;;  %p1991_p5 = scmp.lt.s32.totalorder %s1985_s23, %s1985_s23 }
  0x44   :  { %p1992_p6 = por %p1991_p5, %p1990_p4 }
  0x46   :  { %p1993_p7 = pnand %p1992_p6, %p1986_p3 }
  0x48   :  { %1996 = shalt.err (!%p1993_p7)
}
  0x49   :  { %s2447_s26 = smov 64   ;;  %s2448_s28 = smov 4  }
  0x4a   :  { %100 = dma.hbm_to_vmem [thread:$0]  %s2483_s9, 128, %s95_s16, [#allocation6], %s2447_s26, %s2447_s26, %s2448_s28  }
  0x4b   :  { %s1997_s1 = scalar_lea.hbm %s2503_s25, 16 }
  0x4c   :  { %p1998_p8 = scmp.ne.s32.totalorder %s2503_s25, %s1997_s1  ;;  %p2001_p9 = scmp.lt.u32.totalorder %s1997_s1, %s2503_s25 }
  0x4e   :  { %p2003_p10 = pnand %p2001_p9, %p1998_p8 }
  0x50   :  { %2006 = shalt.err (!%p2003_p10)
}
  0x51   :  { %s2007_s2 = scalar_lea.vmem %s2630_s22, 16  ;;  %s2011_s7 = scalar_lea.vmem %s2630_s22, 32 }
  0x52   :  { %p2008_p11 = scmp.ne.s32.totalorder %s2630_s22, %s2007_s2  ;;  %p2012_p12 = scmp.lt.s32.totalorder %s2630_s22, %s2630_s22 }
  0x53   :  { %p2013_p13 = scmp.lt.s32.totalorder %s2011_s7, %s2007_s2 }
  0x55   :  { %p2014_p0 = por %p2013_p13, %p2012_p12 }
  0x57   :  { %p2015_p1 = pnand %p2014_p0, %p2008_p11 }
  0x59   :  { %2018 = shalt.err (!%p2015_p1)
}
  0x5a   :  { %126 = dma.hbm_to_vmem [thread:$0]  %s2503_s25, 16, %s2630_s22, [#allocation9]  }
  0x5b   :  { %s2449_s9 = smov [#allocation11]   ;;  %s2450_s11 = smov [#allocation14]  }
  0x5c   :  { %s143_s10 = sshll.u32 %s2449_s9, 4  ;;  %s165_s15 = sshll.u32 %s2450_s11, 4  ;;  %s144_s10 = int_to_ptr.vmem [resolvable:$true] %s143_s10  ;;  %s166_s15 = int_to_ptr.vmem [resolvable:$true] %s165_s15 }
  0x5d   :  { %s2019_s16 = scalar_lea.hbm %s2513_s3, 16 }
  0x5e   :  { %p2020_p2 = scmp.ne.s32.totalorder %s2513_s3, %s2019_s16  ;;  %p2023_p3 = scmp.lt.u32.totalorder %s2019_s16, %s2513_s3 }
  0x60   :  { %p2025_p4 = pnand %p2023_p3, %p2020_p2 }
  0x62   :  { %2028 = shalt.err (!%p2025_p4)
}
  0x63   :  { %s2029_s18 = scalar_lea.vmem %s144_s10, 16  ;;  %s2033_s0 = scalar_lea.vmem %s144_s10, 32 }
  0x64   :  { %p2030_p5 = scmp.ne.s32.totalorder %s144_s10, %s2029_s18  ;;  %p2034_p6 = scmp.lt.s32.totalorder %s144_s10, %s144_s10 }
  0x65   :  { %p2035_p7 = scmp.lt.s32.totalorder %s2033_s0, %s2029_s18 }
  0x67   :  { %p2036_p8 = por %p2035_p7, %p2034_p6 }
  0x69   :  { %p2037_p9 = pnand %p2036_p8, %p2030_p5 }
  0x6b   :  { %2040 = shalt.err (!%p2037_p9)
}
  0x6c   :  { %146 = dma.hbm_to_vmem [thread:$0]  %s2513_s3, 16, %s144_s10, [#allocation12]  }
  0x6d   :  { %s2041_s25 = scalar_lea.hbm %s2528_s19, 16 }
  0x6e   :  { %p2042_p10 = scmp.ne.s32.totalorder %s2528_s19, %s2041_s25  ;;  %p2045_p11 = scmp.lt.u32.totalorder %s2041_s25, %s2528_s19 }
  0x70   :  { %p2047_p12 = pnand %p2045_p11, %p2042_p10 }
  0x72   :  { %2050 = shalt.err (!%p2047_p12)
}
  0x73   :  { %s2051_s22 = scalar_lea.vmem %s166_s15, 16  ;;  %s2055_s23 = scalar_lea.vmem %s166_s15, 32 }
  0x74   :  { %p2052_p13 = scmp.ne.s32.totalorder %s166_s15, %s2051_s22  ;;  %p2056_p0 = scmp.lt.s32.totalorder %s166_s15, %s166_s15 }
  0x75   :  { %p2057_p1 = scmp.lt.s32.totalorder %s2055_s23, %s2051_s22 }
  0x77   :  { %p2058_p2 = por %p2057_p1, %p2056_p0 }
  0x79   :  { %p2059_p3 = pnand %p2058_p2, %p2052_p13 }
  0x7b   :  { %2062 = shalt.err (!%p2059_p3)
}
  0x7c   :  { %168 = dma.hbm_to_vmem [thread:$0]  %s2528_s19, 16, %s166_s15, [#allocation15]  }
  0x7d   :  { %s2451_s1 = smov [#allocation17]   ;;  %s2452_s2 = smov [#allocation20]  }
  0x7e   :  { %s184_s3 = sshll.u32 %s2451_s1, 4  ;;  %s207_s7 = sshll.u32 %s2452_s2, 4  ;;  %s185_s3 = int_to_ptr.vmem [resolvable:$true] %s184_s3  ;;  %s208_s7 = int_to_ptr.vmem [resolvable:$true] %s207_s7 }
  0x7f   :  { %s2063_s9 = scalar_lea.hbm %s2538_s30, 128 }
  0x80   :  { %p2064_p4 = scmp.ne.s32.totalorder %s2538_s30, %s2063_s9  ;;  %p2067_p5 = scmp.lt.u32.totalorder %s2063_s9, %s2538_s30 }
  0x82   :  { %p2069_p6 = pnand %p2067_p5, %p2064_p4 }
  0x84   :  { %2072 = shalt.err (!%p2069_p6)
}
  0x85   :  { %s2073_s10 = scalar_lea.vmem %s185_s3, 128  ;;  %p2078_p8 = scmp.lt.s32.totalorder %s185_s3, %s185_s3 }
  0x86   :  { %p2074_p7 = scmp.ne.s32.totalorder %s185_s3, %s2073_s10  ;;  %p2079_p9 = scmp.lt.s32.totalorder %s2073_s10, %s2073_s10 }
  0x88   :  { %p2080_p10 = por %p2079_p9, %p2078_p8 }
  0x8a   :  { %p2081_p11 = pnand %p2080_p10, %p2074_p7 }
  0x8c   :  { %2084 = shalt.err (!%p2081_p11)
}
  0x8d   :  { %190 = dma.hbm_to_vmem [thread:$0]  %s2538_s30, 128, %s185_s3, [#allocation18], %s2447_s26, %s2447_s26, %s2448_s28  }
  0x8e   :  { %s2085_s19 = scalar_lea.hbm %s2548_s12, 16 }
  0x8f   :  { %p2086_p12 = scmp.ne.s32.totalorder %s2548_s12, %s2085_s19  ;;  %p2089_p13 = scmp.lt.u32.totalorder %s2085_s19, %s2548_s12 }
  0x91   :  { %p2091_p0 = pnand %p2089_p13, %p2086_p12 }
  0x93   :  { %2094 = shalt.err (!%p2091_p0)
}
  0x94   :  { %s2095_s11 = scalar_lea.vmem %s208_s7, 16  ;;  %s2099_s15 = scalar_lea.vmem %s208_s7, 32 }
  0x95   :  { %p2096_p1 = scmp.ne.s32.totalorder %s208_s7, %s2095_s11  ;;  %p2100_p2 = scmp.lt.s32.totalorder %s208_s7, %s208_s7 }
  0x96   :  { %p2101_p3 = scmp.lt.s32.totalorder %s2099_s15, %s2095_s11 }
  0x98   :  { %p2102_p4 = por %p2101_p3, %p2100_p2 }
  0x9a   :  { %p2103_p5 = pnand %p2102_p4, %p2096_p1 }
  0x9c   :  { %2106 = shalt.err (!%p2103_p5)
}
  0x9d   :  { %210 = dma.hbm_to_vmem [thread:$0]  %s2548_s12, 16, %s208_s7, [#allocation21]  }
  0x9e   :  { %s2453_s16 = smov [#allocation23]   ;;  %s2454_s18 = smov [#allocation26]  }
  0x9f   :  { %s229_s30 = sshll.u32 %s2453_s16, 4  ;;  %s260_s0 = sshll.u32 %s2454_s18, 4  ;;  %s230_s30 = int_to_ptr.vmem [resolvable:$true] %s229_s30  ;;  %s2668_s0 = int_to_ptr.vmem [resolvable:$true] %s260_s0 }
  0xa0   :  { %s2107_s25 = scalar_lea.hbm %s2563_s4, 16 }
  0xa1   :  { %p2108_p6 = scmp.ne.s32.totalorder %s2563_s4, %s2107_s25  ;;  %p2111_p7 = scmp.lt.u32.totalorder %s2107_s25, %s2563_s4 }
  0xa3   :  { %p2113_p8 = pnand %p2111_p7, %p2108_p6 }
  0xa5   :  { %2116 = shalt.err (!%p2113_p8)
}
  0xa6   :  { %s2117_s22 = scalar_lea.vmem %s230_s30, 16  ;;  %s2121_s23 = scalar_lea.vmem %s230_s30, 32 }
  0xa7   :  { %p2118_p9 = scmp.ne.s32.totalorder %s230_s30, %s2117_s22  ;;  %p2122_p10 = scmp.lt.s32.totalorder %s230_s30, %s230_s30 }
  0xa8   :  { %p2123_p11 = scmp.lt.s32.totalorder %s2121_s23, %s2117_s22 }
  0xaa   :  { %p2124_p12 = por %p2123_p11, %p2122_p10 }
  0xac   :  { %p2125_p13 = pnand %p2124_p12, %p2118_p9 }
  0xae   :  { %2128 = shalt.err (!%p2125_p13)
}
  0xaf   :  { %232 = dma.hbm_to_vmem [thread:$0]  %s2563_s4, 16, %s230_s30, [#allocation24]  }
  0xb0   :  { %s2129_s12 = scalar_lea.hbm %s2603_s21, 256 }
  0xb1   :  { %p2130_p0 = scmp.ne.s32.totalorder %s2603_s21, %s2129_s12  ;;  %p2133_p1 = scmp.lt.u32.totalorder %s2129_s12, %s2603_s21 }
  0xb3   :  { %p2135_p2 = pnand %p2133_p1, %p2130_p0 }
  0xb5   :  { %2138 = shalt.err (!%p2135_p2)
}
  0xb6   :  { %s2139_s1 = scalar_lea.vmem %s2668_s0, 256  ;;  %p2144_p4 = scmp.lt.s32.totalorder %s2668_s0, %s2668_s0 }
  0xb7   :  { %p2140_p3 = scmp.ne.s32.totalorder %s2668_s0, %s2139_s1  ;;  %p2145_p5 = scmp.lt.s32.totalorder %s2139_s1, %s2139_s1 }
  0xb9   :  { %p2146_p6 = por %p2145_p5, %p2144_p4 }
  0xbb   :  { %p2147_p7 = pnand %p2146_p6, %p2140_p3 }
  0xbd   :  { %2150 = shalt.err (!%p2147_p7)
}
  0xbe   :  { %266 = dma.hbm_to_vmem [thread:$0]  %s2603_s21, 256, %s2668_s0, [#allocation27], %s2447_s26, %s2447_s26, %s2448_s28  }
  0xbf   :  { %s2455_s4 = smov [#allocation2]   ;;  %s2456_s2 = smov [#allocation7]  }
  0xc0   :  { %s82_s3 = sshll.u32 %s2455_s4, 4  ;;  %s106_s7 = sshll.u32 %s2456_s2, 4  ;;  %s83_s3 = int_to_ptr.vmem [resolvable:$true] %s82_s3  ;;  %s2686_s7 = int_to_ptr.vmem [resolvable:$true] %s106_s7 }
  0xc1   :  { %s2151_s9 = scalar_lea.hbm %s2478_s5, 128 }
  0xc2   :  { %p2152_p8 = scmp.ne.s32.totalorder %s2478_s5, %s2151_s9  ;;  %p2155_p9 = scmp.lt.u32.totalorder %s2151_s9, %s2478_s5 }
  0xc4   :  { %p2157_p10 = pnand %p2155_p9, %p2152_p8 }
  0xc6   :  { %2160 = shalt.err (!%p2157_p10)
}
  0xc7   :  { %s2161_s10 = scalar_lea.vmem %s83_s3, 128  ;;  %p2166_p12 = scmp.lt.s32.totalorder %s83_s3, %s83_s3 }
  0xc8   :  { %p2162_p11 = scmp.ne.s32.totalorder %s83_s3, %s2161_s10  ;;  %p2167_p13 = scmp.lt.s32.totalorder %s2161_s10, %s2161_s10 }
  0xca   :  { %p2168_p0 = por %p2167_p13, %p2166_p12 }
  0xcc   :  { %p2169_p1 = pnand %p2168_p0, %p2162_p11 }
  0xce   :  { %2172 = shalt.err (!%p2169_p1)
}
  0xcf   :  { %88 = dma.hbm_to_vmem [thread:$0]  %s2478_s5, 128, %s83_s3, [#allocation3], %s2447_s26, %s2447_s26, %s2448_s28  }
  0xd0   :  { %s2173_s21 = scalar_lea.hbm %s2488_s13, 128 }
  0xd1   :  { %p2174_p2 = scmp.ne.s32.totalorder %s2488_s13, %s2173_s21  ;;  %p2177_p3 = scmp.lt.u32.totalorder %s2173_s21, %s2488_s13 }
  0xd3   :  { %p2179_p4 = pnand %p2177_p3, %p2174_p2 }
  0xd5   :  { %2182 = shalt.err (!%p2179_p4)
}
  0xd6   :  { %s2183_s19 = scalar_lea.vmem %s2686_s7, 128  ;;  %p2188_p6 = scmp.lt.s32.totalorder %s2686_s7, %s2686_s7 }
  0xd7   :  { %p2184_p5 = scmp.ne.s32.totalorder %s2686_s7, %s2183_s19  ;;  %p2189_p7 = scmp.lt.s32.totalorder %s2183_s19, %s2183_s19 }
  0xd9   :  { %p2190_p8 = por %p2189_p7, %p2188_p6 }
  0xdb   :  { %p2191_p9 = pnand %p2190_p8, %p2184_p5 }
  0xdd   :  { %2194 = shalt.err (!%p2191_p9)
}
  0xde   :  { %112 = dma.hbm_to_vmem [thread:$0]  %s2488_s13, 128, %s2686_s7, [#allocation6], %s2447_s26, %s2447_s26, %s2448_s28  }
  0xdf   :  { %s2457_s5 = smov [#allocation10]   ;;  %s2458_s15 = smov [#allocation13]  }
  0xe0   :  { %s133_s11 = sshll.u32 %s2457_s5, 4  ;;  %s155_s16 = sshll.u32 %s2458_s15, 4  ;;  %s134_s11 = int_to_ptr.vmem [resolvable:$true] %s133_s11  ;;  %s156_s16 = int_to_ptr.vmem [resolvable:$true] %s155_s16 }
  0xe1   :  { %s2195_s30 = scalar_lea.hbm %s2508_s29, 16 }
  0xe2   :  { %p2196_p10 = scmp.ne.s32.totalorder %s2508_s29, %s2195_s30  ;;  %p2199_p11 = scmp.lt.u32.totalorder %s2195_s30, %s2508_s29 }
  0xe4   :  { %p2201_p12 = pnand %p2199_p11, %p2196_p10 }
  0xe6   :  { %2204 = shalt.err (!%p2201_p12)
}
  0xe7   :  { %s2205_s18 = scalar_lea.vmem %s134_s11, 16  ;;  %s2209_s0 = scalar_lea.vmem %s134_s11, 32 }
  0xe8   :  { %p2206_p13 = scmp.ne.s32.totalorder %s134_s11, %s2205_s18  ;;  %p2210_p0 = scmp.lt.s32.totalorder %s134_s11, %s134_s11 }
  0xe9   :  { %p2211_p1 = scmp.lt.s32.totalorder %s2209_s0, %s2205_s18 }
  0xeb   :  { %p2212_p2 = por %p2211_p1, %p2210_p0 }
  0xed   :  { %p2213_p3 = pnand %p2212_p2, %p2206_p13 }
  0xef   :  { %2216 = shalt.err (!%p2213_p3)
}
  0xf0   :  { %136 = dma.hbm_to_vmem [thread:$0]  %s2508_s29, 16, %s134_s11, [#allocation9]  }
  0xf1   :  { %s2217_s13 = scalar_lea.hbm %s2523_s14, 16 }
  0xf2   :  { %p2218_p4 = scmp.ne.s32.totalorder %s2523_s14, %s2217_s13  ;;  %p2221_p5 = scmp.lt.u32.totalorder %s2217_s13, %s2523_s14 }
  0xf4   :  { %p2223_p6 = pnand %p2221_p5, %p2218_p4 }
  0xf6   :  { %2226 = shalt.err (!%p2223_p6)
}
  0xf7   :  { %s2227_s25 = scalar_lea.vmem %s156_s16, 16  ;;  %s2231_s22 = scalar_lea.vmem %s156_s16, 32 }
  0xf8   :  { %p2228_p7 = scmp.ne.s32.totalorder %s156_s16, %s2227_s25  ;;  %p2232_p8 = scmp.lt.s32.totalorder %s156_s16, %s156_s16 }
  0xf9   :  { %p2233_p9 = scmp.lt.s32.totalorder %s2231_s22, %s2227_s25 }
  0xfb   :  { %p2234_p10 = por %p2233_p9, %p2232_p8 }
  0xfd   :  { %p2235_p11 = pnand %p2234_p10, %p2228_p7 }
  0xff   :  { %2238 = shalt.err (!%p2235_p11)
}
 0x100   :  { %158 = dma.hbm_to_vmem [thread:$0]  %s2523_s14, 16, %s156_s16, [#allocation12]  }
 0x101   :  { %s2459_s23 = smov [#allocation16]   ;;  %s2460_s12 = smov [#allocation19]  }
 0x102   :  { %s175_s29 = sshll.u32 %s2459_s23, 4  ;;  %s197_s1 = sshll.u32 %s2460_s12, 4  ;;  %s176_s29 = int_to_ptr.vmem [resolvable:$true] %s175_s29  ;;  %s198_s1 = int_to_ptr.vmem [resolvable:$true] %s197_s1 }
 0x103   :  { %s2239_s4 = scalar_lea.hbm %s2533_s24, 16 }
 0x104   :  { %p2240_p12 = scmp.ne.s32.totalorder %s2533_s24, %s2239_s4  ;;  %p2243_p13 = scmp.lt.u32.totalorder %s2239_s4, %s2533_s24 }
 0x106   :  { %p2245_p0 = pnand %p2243_p13, %p2240_p12 }
 0x108   :  { %2248 = shalt.err (!%p2245_p0)
}
 0x109   :  { %s2249_s3 = scalar_lea.vmem %s176_s29, 16  ;;  %s2253_s2 = scalar_lea.vmem %s176_s29, 32 }
 0x10a   :  { %p2250_p1 = scmp.ne.s32.totalorder %s176_s29, %s2249_s3  ;;  %p2254_p2 = scmp.lt.s32.totalorder %s176_s29, %s176_s29 }
 0x10b   :  { %p2255_p3 = scmp.lt.s32.totalorder %s2253_s2, %s2249_s3 }
 0x10d   :  { %p2256_p4 = por %p2255_p3, %p2254_p2 }
 0x10f   :  { %p2257_p5 = pnand %p2256_p4, %p2250_p1 }
 0x111   :  { %2260 = shalt.err (!%p2257_p5)
}
 0x112   :  { %178 = dma.hbm_to_vmem [thread:$0]  %s2533_s24, 16, %s176_s29, [#allocation15]  }
 0x113   :  { %s2261_s14 = scalar_lea.hbm %s2543_s6, 16 }
 0x114   :  { %p2262_p6 = scmp.ne.s32.totalorder %s2543_s6, %s2261_s14  ;;  %p2265_p7 = scmp.lt.u32.totalorder %s2261_s14, %s2543_s6 }
 0x116   :  { %p2267_p8 = pnand %p2265_p7, %p2262_p6 }
 0x118   :  { %2270 = shalt.err (!%p2267_p8)
}
 0x119   :  { %s2271_s7 = scalar_lea.vmem %s198_s1, 16  ;;  %s2275_s9 = scalar_lea.vmem %s198_s1, 32 }
 0x11a   :  { %p2272_p9 = scmp.ne.s32.totalorder %s198_s1, %s2271_s7  ;;  %p2276_p10 = scmp.lt.s32.totalorder %s198_s1, %s198_s1 }
 0x11b   :  { %p2277_p11 = scmp.lt.s32.totalorder %s2275_s9, %s2271_s7 }
 0x11d   :  { %p2278_p12 = por %p2277_p11, %p2276_p10 }
 0x11f   :  { %p2279_p13 = pnand %p2278_p12, %p2272_p9 }
 0x121   :  { %2282 = shalt.err (!%p2279_p13)
}
 0x122   :  { %s2917_s10 = sld [smem:[#allocation46_spill]]  ;;  %s2461_s21 = smov [#allocation22]  }
 0x123   :  { %200 = dma.hbm_to_vmem [thread:$0]  %s2543_s6, 16, %s198_s1, [#allocation18]  }
 0x124   :  { %s217_s24 = sshll.u32 %s2461_s21, 4  ;;  %s2462_s19 = smov [#allocation25]   ;;  %s218_s24 = int_to_ptr.vmem [resolvable:$true] %s217_s24 }
 0x125   :  { %s239_s5 = sshll.u32 %s2462_s19, 4  ;;  %s240_s5 = int_to_ptr.vmem [resolvable:$true] %s239_s5 }
 0x128   :  { %s2283_s11 = scalar_lea.hbm %s2917_s10, 16 }
 0x129   :  { %p2284_p0 = scmp.ne.s32.totalorder %s2917_s10, %s2283_s11  ;;  %p2287_p1 = scmp.lt.u32.totalorder %s2283_s11, %s2917_s10 }
 0x12b   :  { %p2289_p2 = pnand %p2287_p1, %p2284_p0 }
 0x12d   :  { %2292 = shalt.err (!%p2289_p2)
}
 0x12e   :  { %s2293_s15 = scalar_lea.vmem %s218_s24, 16  ;;  %s2297_s16 = scalar_lea.vmem %s218_s24, 32 }
 0x12f   :  { %p2294_p3 = scmp.ne.s32.totalorder %s218_s24, %s2293_s15  ;;  %p2298_p4 = scmp.lt.s32.totalorder %s218_s24, %s218_s24 }
 0x130   :  { %p2299_p5 = scmp.lt.s32.totalorder %s2297_s16, %s2293_s15 }
 0x132   :  { %p2300_p6 = por %p2299_p5, %p2298_p4 }
 0x134   :  { %p2301_p7 = pnand %p2300_p6, %p2294_p3 }
 0x136   :  { %2304 = shalt.err (!%p2301_p7)
}
 0x137   :  { %s2918_s6 = sld [smem:[#allocation48_spill]] }
 0x138   :  { %220 = dma.hbm_to_vmem [thread:$0]  %s2917_s10, 16, %s218_s24, [#allocation21]  }
 0x13d   :  { %s2305_s30 = scalar_lea.hbm %s2918_s6, 16 }
 0x13e   :  { %p2306_p8 = scmp.ne.s32.totalorder %s2918_s6, %s2305_s30  ;;  %p2309_p9 = scmp.lt.u32.totalorder %s2305_s30, %s2918_s6 }
 0x140   :  { %p2311_p10 = pnand %p2309_p9, %p2306_p8 }
 0x142   :  { %2314 = shalt.err (!%p2311_p10)
}
 0x143   :  { %s2315_s18 = scalar_lea.vmem %s240_s5, 16  ;;  %s2319_s0 = scalar_lea.vmem %s240_s5, 32 }
 0x144   :  { %p2316_p11 = scmp.ne.s32.totalorder %s240_s5, %s2315_s18  ;;  %p2320_p12 = scmp.lt.s32.totalorder %s240_s5, %s240_s5 }
 0x145   :  { %p2321_p13 = scmp.lt.s32.totalorder %s2319_s0, %s2315_s18 }
 0x147   :  { %p2322_p0 = por %p2321_p13, %p2320_p12 }
 0x149   :  { %p2323_p1 = pnand %p2322_p0, %p2316_p11 }
 0x14b   :  { %2326 = shalt.err (!%p2323_p1)
}
 0x14c   :  { %s2919_s13 = sld [smem:[#allocation55_spill]]  ;;  %s2463_s25 = smov [#allocation28]  }
 0x14d   :  { %242 = dma.hbm_to_vmem [thread:$0]  %s2918_s6, 16, %s240_s5, [#allocation24]  }
 0x14e   :  { %s273_s22 = sshll.u32 %s2463_s25, 4  ;;  %s2464_s23 = smov [#allocation29]   ;;  %s274_s22 = int_to_ptr.vmem [resolvable:$true] %s273_s22 }
 0x14f   :  { %s284_s29 = sshll.u32 %s2464_s23, 4  ;;  %s2731_s29 = int_to_ptr.vmem [resolvable:$true] %s284_s29 }
 0x152   :  { %s2327_s12 = scalar_lea.hbm %s2919_s13, 64 }
 0x153   :  { %p2328_p2 = scmp.ne.s32.totalorder %s2919_s13, %s2327_s12  ;;  %p2331_p3 = scmp.lt.u32.totalorder %s2327_s12, %s2919_s13 }
 0x155   :  { %p2333_p4 = pnand %p2331_p3, %p2328_p2 }
 0x157   :  { %2336 = shalt.err (!%p2333_p4)
}
 0x158   :  { %s2337_s1 = scalar_lea.vmem %s274_s22, 64  ;;  %p2342_p6 = scmp.lt.s32.totalorder %s274_s22, %s274_s22 }
 0x159   :  { %p2338_p5 = scmp.ne.s32.totalorder %s274_s22, %s2337_s1  ;;  %p2343_p7 = scmp.lt.s32.totalorder %s2337_s1, %s2337_s1 }
 0x15b   :  { %p2344_p8 = por %p2343_p7, %p2342_p6 }
 0x15d   :  { %p2345_p9 = pnand %p2344_p8, %p2338_p5 }
 0x15f   :  { %2348 = shalt.err (!%p2345_p9)
}
 0x160   :  { %276 = dma.hbm_to_vmem [thread:$0]  %s2919_s13, 64, %s274_s22, [#allocation27]  }
 0x161   :  { %s2349_s4 = scalar_lea.hbm %s2618_s27, 256 }
 0x162   :  { %p2350_p10 = scmp.ne.s32.totalorder %s2618_s27, %s2349_s4  ;;  %p2353_p11 = scmp.lt.u32.totalorder %s2349_s4, %s2618_s27 }
 0x164   :  { %p2355_p12 = pnand %p2353_p11, %p2350_p10 }
 0x166   :  { %2358 = shalt.err (!%p2355_p12)
}
 0x167   :  { %s2359_s3 = scalar_lea.vmem %s2731_s29, 256  ;;  %p2364_p0 = scmp.lt.s32.totalorder %s2731_s29, %s2731_s29 }
 0x168   :  { %p2360_p13 = scmp.ne.s32.totalorder %s2731_s29, %s2359_s3  ;;  %p2365_p1 = scmp.lt.s32.totalorder %s2359_s3, %s2359_s3 }
 0x16a   :  { %p2366_p2 = por %p2365_p1, %p2364_p0 }
 0x16c   :  { %p2367_p3 = pnand %p2366_p2, %p2360_p13 }
 0x16e   :  { %2370 = shalt.err (!%p2367_p3)
}
 0x16f   :  { %290 = dma.hbm_to_vmem [thread:$0]  %s2618_s27, 256, %s2731_s29, [#allocation30], %s2447_s26, %s2447_s26, %s2448_s28  }
 0x170   :  { %2393 = dma.done.wait [#allocation3], 128  }
 0x171   :  { %2394 = vsyncadd [#allocation3], 4294967168 }
 0x172   :  { %2395 = dma.done.wait [#allocation6], 256  }
 0x173   :  { %2396 = vsyncadd [#allocation6], 4294967040 }
 0x174   :  { %2397 = dma.done.wait [#allocation9], 32  }
 0x175   :  { %2398 = vsyncadd [#allocation9], 4294967264 }
 0x176   :  { %2399 = dma.done.wait [#allocation12], 32  }
 0x177   :  { %2400 = vsyncadd [#allocation12], 4294967264 }
 0x178   :  { %2401 = dma.done.wait [#allocation15], 32  }
 0x179   :  { %2402 = vsyncadd [#allocation15], 4294967264 }
 0x17a   :  { %2403 = dma.done.wait [#allocation18], 144  }
 0x17b   :  { %2404 = vsyncadd [#allocation18], 4294967152 }
 0x17c   :  { %2405 = dma.done.wait [#allocation21], 32  }
 0x17d   :  { %2406 = vsyncadd [#allocation21], 4294967264 }
 0x17e   :  { %2407 = dma.done.wait [#allocation24], 32  }
 0x17f   :  { %2408 = vsyncadd [#allocation24], 4294967264 }
 0x180   :  { %2409 = dma.done.wait [#allocation27], 320  }
 0x181   :  { %2410 = vsyncadd [#allocation27], 4294966976 }
 0x182   :  { %2411 = dma.done.wait [#allocation30], 256  }
 0x183   :  { %2412 = vsyncadd [#allocation30], 4294967040  ;;  %s2920_s27 = sld [smem:[#allocation44_spill]]  ;;  %v2465_v0 = vmov 0.0   ;;  %vm2466_vm0 = vmmov 0   ;;  %v1920_v9 = vld [vmem:[#allocation2] sm:$0xff]  }
 0x184   :  { %1705 = vmatprep.subr.bf16.mxu0 %v2465_v0  ;;  %1721 = vmatprep.mubr.msk.bf16.mxu0 %vm2466_vm0, %v2465_v0  ;;  %v1921_v10 = vld [vmem:[#allocation17] sm:$0xff]   ;;  %vm696_vm1 = vcmask 130048   ;;  %v1579_v12 = vld [vmem:[#allocation8] ss:$0 sm:$0xff]  ;;  %s2921_s26 = sld [smem:[#allocation45_spill]]  ;;  %vm741_vm2 = vcmask 523264  }
 0x185   :  { %1725 = vmatprep.subr.bf16.mxu1 %v2465_v0  ;;  %1741 = vmatprep.mubr.msk.bf16.mxu1 %vm2466_vm0, %v2465_v0  ;;  %v1922_v11 = vld [vmem:[#allocation5] sm:$0xff]   ;;  %s2922_s28 = sld [smem:[#allocation47_spill]]  ;;  %s2923_s2 = sld [smem:[#allocation51_spill]]  ;;  %vm1142_vm11 = vcmask 261120   ;;  %vm1279_vm14 = vcmask 1043456   ;;  %vm1275_vm15 = vcmask 64512  }
 0x186   :  { %v1602_v19 = vld [vmem:[#allocation19] ss:$0 sm:$0xff]  ;;  %s2924_s14 = sld [smem:[#allocation49_spill]]  ;;  %s2925_s7 = sld [smem:[#allocation50_spill]] }
 0x187   :  { %s2926_s9 = sld [smem:[#allocation53_spill]]  ;;  %s2927_s10 = sld [smem:[#allocation54_spill]] }
 0x188   :  { %s2928_s21 = sld [smem:[#allocation52_spill]]  ;;  %s2929_s24 = sld [smem:[#allocation43_spill]] }
 0x189   :  { %v1912_v1 = vld [vmem:[%s2920_s27] sm:$0xff]   ;;  %v1913_v2 = vld [vmem:[%s2920_s27 + $0x8] sm:$0xff]   ;;  %v1914_v3 = vld [vmem:[%s2920_s27 + $0x10] sm:$0xff]  }
 0x18a   :  { %1706 = vmatpush3.bf16.msra.mxu0 %v1912_v1  ;;  %v1915_v4 = vld [vmem:[%s2920_s27 + $0x18] sm:$0xff]   ;;  %v1916_v5 = vld [vmem:[%s2920_s27 + $0x20] sm:$0xff]   ;;  %v1917_v6 = vld [vmem:[%s2920_s27 + $0x28] sm:$0xff]  }
 0x18b   :  { %1707 = vmatprep.subr.bf16.mxu0 %v2465_v0  ;;  %v1918_v7 = vld [vmem:[%s2920_s27 + $0x30] sm:$0xff]   ;;  %v1919_v8 = vld [vmem:[%s2920_s27 + $0x38] sm:$0xff]   ;;  %v1923_v28 = vld [vmem:[%s2921_s26] sm:$0xff]  }
 0x18c   :  { %1726 = vmatpush3.bf16.msra.mxu1 %v1923_v28  ;;  %v1924_v47 = vld [vmem:[%s2921_s26 + $0x8] sm:$0xff]   ;;  %v1925_v48 = vld [vmem:[%s2921_s26 + $0x10] sm:$0xff]   ;;  %v1926_v49 = vld [vmem:[%s2921_s26 + $0x18] sm:$0xff]  }
 0x18d   :  { %1727 = vmatprep.subr.bf16.mxu1 %v2465_v0  ;;  %v1927_v50 = vld [vmem:[%s2921_s26 + $0x20] sm:$0xff]   ;;  %v1928_v51 = vld [vmem:[%s2921_s26 + $0x28] sm:$0xff]   ;;  %v1929_v52 = vld [vmem:[%s2921_s26 + $0x30] sm:$0xff]  }
 0x18e   :  { %1708 = vmatpush3.bf16.msra.mxu0 %v1913_v2  ;;  %v1930_v53 = vld [vmem:[%s2921_s26 + $0x38] sm:$0xff]  }
 0x18f   :  { %1709 = vmatprep.subr.bf16.mxu0 %v2465_v0 }
 0x190   :  { %1728 = vmatpush3.bf16.msra.mxu1 %v1924_v47 }
 0x191   :  { %1729 = vmatprep.subr.bf16.mxu1 %v2465_v0 }
 0x192   :  { %1710 = vmatpush3.bf16.msra.mxu0 %v1914_v3  ;;  %v1589_v3 = vld [vmem:[#allocation10] ss:$0 sm:$0xff] }
 0x193   :  { %1711 = vmatprep.subr.bf16.mxu0 %v2465_v0 }
 0x194   :  { %1730 = vmatpush3.bf16.msra.mxu1 %v1925_v48 }
 0x195   :  { %1731 = vmatprep.subr.bf16.mxu1 %v2465_v0 }
 0x196   :  { %1712 = vmatpush3.bf16.msra.mxu0 %v1915_v4 }
 0x197   :  { %1713 = vmatprep.subr.bf16.mxu0 %v2465_v0 }
 0x198   :  { %1732 = vmatpush3.bf16.msra.mxu1 %v1926_v49 }
 0x199   :  { %1733 = vmatprep.subr.bf16.mxu1 %v2465_v0 }
 0x19a   :  { %1714 = vmatpush3.bf16.msra.mxu0 %v1916_v5 }
 0x19b   :  { %1715 = vmatprep.subr.bf16.mxu0 %v2465_v0 }
 0x19c   :  { %1734 = vmatpush3.bf16.msra.mxu1 %v1927_v50 }
 0x19d   :  { %1735 = vmatprep.subr.bf16.mxu1 %v2465_v0 }
 0x19e   :  { %1716 = vmatpush3.bf16.msra.mxu0 %v1917_v6  ;;  %v1590_v6 = vld [vmem:[#allocation11] ss:$0 sm:$0xff] }
 0x19f   :  { %1717 = vmatprep.subr.bf16.mxu0 %v2465_v0 }
 0x1a0   :  { %1736 = vmatpush3.bf16.msra.mxu1 %v1928_v51 }
 0x1a1   :  { %1737 = vmatprep.subr.bf16.mxu1 %v2465_v0 }
 0x1a2   :  { %1718 = vmatpush3.bf16.msra.mxu0 %v1918_v7 }
 0x1a3   :  { %1719 = vmatprep.subr.bf16.mxu0 %v2465_v0 }
 0x1a4   :  { %1738 = vmatpush3.bf16.msra.mxu1 %v1929_v52 }
 0x1a5   :  { %1739 = vmatprep.subr.bf16.mxu1 %v2465_v0 }
 0x1a6   :  { %1720 = vmatpush3.bf16.msra.mxu0 %v1919_v8 }
 0x1a7   :  { %1745 = vmatprep.subr.bf16.mxu0 %v2465_v0 }
 0x1a8   :  { %1740 = vmatpush3.bf16.msra.mxu1 %v1930_v53 }
 0x1a9   :  { %1722 = vmatmul.mubr.bf16.vlgmr.msra.gmra.mrb[0].mxu0 %v1920_v9  ;;  %1751 = vmatprep.subr.bf16.mxu1 %v2465_v0 }
 0x1aa   :  { %1746 = vmatpush3.bf16.msra.mxu0 %v1921_v10  ;;  %1747 = vmatprep.mubr.msk.bf16.mxu0 %vm2466_vm0, %v2465_v0 }
 0x1ab   :  { %1763 = vmatprep.subr.bf16.mxu0 %v2465_v0 }
 0x1b1   :  { %1748 = vmatmul.mubr.msk.bf16.vlgmr.msra.gmra.mrb[4].mxu0 %vm696_vm1, %v1922_v11 }
 0x1b2   :  { %1771 = vmatprep.mubr.msk.bf16.mxu0 %vm2466_vm0, %v2465_v0 }
 0x27c   :  { %v461_v13 = vpop.f32.mrb[0].mxu0 }
 0x27d   :  { %v462_v14 = vadd.f32 %v1579_v12, %v461_v13  ;;  %v1723_v15 = vpop.f32.mrb[1].mxu0 }
 0x27e   :  { %v464_v16 = vpop.f32.mrb[2].mxu0 }
 0x27f   :  { %468 = vadd.xlane.f32.xlu0 %v462_v14  ;;  %v1724_v17 = vpop.f32.mrb[3].mxu0  ;;  %v465_v18 = vadd.f32 %v1579_v12, %v464_v16 }
 0x283   :  { %470 = vadd.xlane.f32.xlu0 %v465_v18 }
 0x284   :  { %v734_v20 = vpop.f32.mrb[4].mxu0 }
 0x285   :  { %v735_v21 = vadd.f32 %v1602_v19, %v734_v20  ;;  %v1749_v22 = vpop.f32.mrb[5].mxu0 }
 0x286   :  { %v737_v23 = vpop.f32.mrb[6].mxu0 }
 0x287   :  { %v742_v24 = vsel %vm741_vm2, %v735_v21, 0.0  ;;  %v738_v25 = vadd.f32 %v1602_v19, %v737_v23  ;;  %v1750_v26 = vpop.f32.mrb[7].mxu0  ;;  %v1931_v19 = vld [vmem:[%s2922_s28] sm:$0xff]  }
 0x288   :  { %743 = vadd.xlane.f32.xlu1 %v742_v24  ;;  %v1932_v26 = vld [vmem:[%s2922_s28 + $0x8] sm:$0xff]  }
 0x289   :  { %v745_v27 = vsel %vm741_vm2, %v738_v25, 0.0 }
 0x28c   :  { %746 = vadd.xlane.f32.xlu1 %v745_v27  ;;  %v1607_v27 = vld [vmem:[#allocation22] ss:$0 sm:$0xff] }
 0x30c   :  { %v469_v29 = vpop.xlane.xlu0 %468 }
 0x30d   :  { %v473_v30 = vmul.f32 0.0078125, %v469_v29 }
 0x30f   :  { %v475_v31 = vsub.f32 %v462_v14, %v473_v30  ;;  %v1933_v30 = vld [vmem:[%s2922_s28 + $0x10] sm:$0xff]  }
 0x310   :  { %v471_v32 = vpop.xlane.xlu0 %470 }
 0x311   :  { %v474_v33 = vmul.f32 0.0078125, %v471_v32  ;;  %v477_v34 = vmul.f32 %v475_v31, %v475_v31  ;;  %v1934_v32 = vld [vmem:[%s2922_s28 + $0x18] sm:$0xff]  }
 0x313   :  { %v476_v35 = vsub.f32 %v465_v18, %v474_v33  ;;  %479 = vadd.xlane.f32.xlu0 %v477_v34 }
 0x315   :  { %v744_v36 = vpop.xlane.xlu1 %743  ;;  %v478_v37 = vmul.f32 %v476_v35, %v476_v35 }
 0x316   :  { %v749_v38 = vmul.f32 0.015625, %v744_v36 }
 0x317   :  { %481 = vadd.xlane.f32.xlu1 %v478_v37 }
 0x318   :  { %v751_v39 = vsub.f32 %v735_v21, %v749_v38  ;;  %v1606_v21 = vld [vmem:[#allocation20] ss:$0 sm:$0xff] }
 0x319   :  { %v747_v40 = vpop.xlane.xlu1 %746 }
 0x31a   :  { %v750_v41 = vmul.f32 0.015625, %v747_v40  ;;  %v753_v42 = vmul.f32 %v751_v39, %v751_v39 }
 0x31c   :  { %v2780_v43 = vsub.f32 %v738_v25, %v750_v41  ;;  %v755_v44 = vsel %vm741_vm2, %v753_v42, 0.0  ;;  %v1608_v41 = vld [vmem:[#allocation23] ss:$0 sm:$0xff] }
 0x31d   :  { %756 = vadd.xlane.f32.xlu0 %v755_v44 }
 0x31e   :  { %v754_v45 = vmul.f32 %v2780_v43, %v2780_v43 }
 0x320   :  { %v758_v46 = vsel %vm741_vm2, %v754_v45, 0.0 }
 0x321   :  { %759 = vadd.xlane.f32.xlu1 %v758_v46  ;;  %v1591_v46 = vld [vmem:[#allocation13] ss:$0 sm:$0xff] }
 0x3a0   :  { %v480_v54 = vpop.xlane.xlu0 %479 }
 0x3a1   :  { %v483_v55 = vmul.f32 0.0078125, %v480_v54 }
 0x3a3   :  { %v485_v56 = vadd.f32 1e-05, %v483_v55 }
 0x3a4   :  { %v482_v57 = vpop.xlane.xlu1 %481 }
 0x3a5   :  { %1959 = vrsqrt.f32 %v485_v56  ;;  %v484_v58 = vmul.f32 0.0078125, %v482_v57 }
 0x3a7   :  { %v486_v59 = vadd.f32 1e-05, %v484_v58 }
 0x3a9   :  { %1961 = vrsqrt.f32 %v486_v59 }
 0x3aa   :  { %v757_v60 = vpop.xlane.xlu0 %756 }
 0x3ab   :  { %v761_v61 = vmul.f32 0.015625, %v757_v60 }
 0x3ad   :  { %v763_v62 = vadd.f32 1e-05, %v761_v61 }
 0x3ae   :  { %v760_v63 = vpop.xlane.xlu1 %759 }
 0x3af   :  { %v1960_v1 = vpop.eup %1959  ;;  %1963 = vrsqrt.f32 %v763_v62  ;;  %v762_v2 = vmul.f32 0.015625, %v760_v63 }
 0x3b0   :  { %v489_v4 = vmul.f32 %v1960_v1, %v475_v31 }
 0x3b1   :  { %v764_v5 = vadd.f32 1e-05, %v762_v2 }
 0x3b2   :  { %v498_v7 = vmul.f32 %v1589_v3, %v489_v4 }
 0x3b3   :  { %v1962_v8 = vpop.eup %1961  ;;  %1965 = vrsqrt.f32 %v764_v5 }
 0x3b4   :  { %v490_v9 = vmul.f32 %v1962_v8, %v476_v35  ;;  %v507_v10 = vadd.f32 %v1590_v6, %v498_v7  ;;  %v1935_v8 = vld [vmem:[%s2923_s2] sm:$0xff]  }
 0x3b5   :  { %1764 = vmatpush3.bf16.msra.mxu0 %v1935_v8 }
 0x3b6   :  { %v499_v11 = vmul.f32 %v1589_v3, %v490_v9  ;;  %v511_v13 = vmul.f32 0.25, %v507_v10  ;;  %vm509_vm3 = vcmp.gt.f32.partialorder %v507_v10, 0.0  ;;  %1765 = vmatprep.subr.bf16.mxu0 %v2465_v0  ;;  %v1936_v9 = vld [vmem:[%s2923_s2 + $0x8] sm:$0xff]  }
 0x3b8   :  { %v508_v12 = vadd.f32 %v1590_v6, %v499_v11  ;;  %v513_v17 = vsel %vm509_vm3, %v507_v10, %v511_v13  ;;  %v1937_v10 = vld [vmem:[%s2923_s2 + $0x10] sm:$0xff]   ;;  %v1938_v11 = vld [vmem:[%s2923_s2 + $0x18] sm:$0xff]  }
 0x3b9   :  { %v1964_v14 = vpop.eup %1963  ;;  %1766 = vmatpush3.bf16.msra.mxu0 %v1936_v9 }
 0x3ba   :  { %vm510_vm4 = vcmp.gt.f32.partialorder %v508_v12, 0.0  ;;  %v512_v15 = vmul.f32 0.25, %v508_v12  ;;  %v767_v16 = vmul.f32 %v1964_v14, %v751_v39  ;;  %1767 = vmatprep.subr.bf16.mxu0 %v2465_v0 }
 0x3bc   :  { %v514_v18 = vsel %vm510_vm4, %v508_v12, %v512_v15  ;;  %v776_v24 = vmul.f32 %v1606_v21, %v767_v16 }
 0x3bd   :  { %v1966_v20 = vpop.eup %1965  ;;  %v515_v22 = vpack.c.bf16 %v514_v18, %v513_v17  ;;  %1768 = vmatpush3.bf16.msra.mxu0 %v1937_v10 }
 0x3be   :  { %v768_v23 = vmul.f32 %v1966_v20, %v2780_v43  ;;  %v785_v29 = vadd.f32 %v1607_v27, %v776_v24  ;;  %1769 = vmatprep.subr.bf16.mxu0 %v2465_v0 }
 0x3bf   :  { %1742 = vmatmul.mubr.bf16.vlgmr.msra.gmra.mrb[0].mxu1 %v515_v22 }
 0x3c0   :  { %v777_v25 = vmul.f32 %v1606_v21, %v768_v23  ;;  %1752 = vmatpush3.bf16.msra.mxu1 %v1931_v19  ;;  %1759 = vmatprep.mubr.msk.bf16.mxu1 %vm2466_vm0, %v2465_v0  ;;  %v789_v33 = vmul.f32 0.25, %v785_v29  ;;  %vm787_vm6 = vcmp.gt.f32.partialorder %v785_v29, 0.0  ;;  %v1614_v19 = vld [vmem:[#allocation25] ss:$0 sm:$0xff]  ;;  %v1615_v23 = vld [vmem:[%s2924_s14] ss:$0 sm:$0xff] }
 0x3c1   :  { %1753 = vmatprep.subr.bf16.mxu1 %v2465_v0  ;;  %1770 = vmatpush3.bf16.msra.mxu0 %v1938_v11 }
 0x3c2   :  { %v786_v28 = vadd.f32 %v1607_v27, %v777_v25  ;;  %v791_v35 = vsel %vm787_vm6, %v785_v29, %v789_v33  ;;  %1775 = vmatprep.subr.bf16.mxu0 %v2465_v0 }
 0x3c4   :  { %1754 = vmatpush3.bf16.msra.mxu1 %v1932_v26  ;;  %v790_v31 = vmul.f32 0.25, %v786_v28  ;;  %vm788_vm5 = vcmp.gt.f32.partialorder %v786_v28, 0.0 }
 0x3c5   :  { %1755 = vmatprep.subr.bf16.mxu1 %v2465_v0 }
 0x3c6   :  { %v792_v34 = vsel %vm788_vm5, %v786_v28, %v790_v31 }
 0x3c7   :  { %v793_v36 = vpack.c.bf16 %v792_v34, %v791_v35 }
 0x3c8   :  { %1756 = vmatpush3.bf16.msra.mxu1 %v1933_v30 }
 0x3c9   :  { %1757 = vmatprep.subr.bf16.mxu1 %v2465_v0 }
 0x3cc   :  { %1758 = vmatpush3.bf16.msra.mxu1 %v1934_v32 }
 0x3cd   :  { %1803 = vmatprep.subr.bf16.mxu1 %v2465_v0 }
 0x3cf   :  { %1760 = vmatmul.mubr.msk.bf16.vlgmr.msra.gmra.mrb[4].mxu1 %vm741_vm2, %v793_v36 }
 0x3d0   :  { %1807 = vmatprep.mubr.msk.bf16.mxu1 %vm2466_vm0, %v2465_v0 }
 0x492   :  { %v621_v37 = vpop.f32.mrb[0].mxu1 }
 0x493   :  { %v1743_v38 = vpop.f32.mrb[1].mxu1  ;;  %v622_v51 = vadd.f32 %v1591_v46, %v621_v37 }
 0x494   :  { %v624_v39 = vpop.f32.mrb[2].mxu1  ;;  %v1939_v38 = vld [vmem:[%s2925_s7] sm:$0xff]  }
 0x495   :  { %v1744_v40 = vpop.f32.mrb[3].mxu1  ;;  %v625_v52 = vadd.f32 %v1591_v46, %v624_v39 }
 0x496   :  { %v1940_v40 = vld [vmem:[%s2925_s7 + $0x8] sm:$0xff]  }
 0x4a2   :  { %v870_v42 = vpop.f32.mrb[4].mxu1 }
 0x4a3   :  { %v871_v43 = vadd.f32 %v1608_v41, %v870_v42  ;;  %v1761_v44 = vpop.f32.mrb[5].mxu1 }
 0x4a4   :  { %v873_v45 = vpop.f32.mrb[6].mxu1 }
 0x4a5   :  { %v874_v47 = vadd.f32 %v1608_v41, %v873_v45  ;;  %v1762_v48 = vpop.f32.mrb[7].mxu1  ;;  %v877_v49 = vsel %vm741_vm2, %v871_v43, 0.0  ;;  %v1941_v41 = vld [vmem:[%s2925_s7 + $0x10] sm:$0xff]  }
 0x4a6   :  { %878 = vadd.xlane.f32.xlu0 %v877_v49  ;;  %v1600_v48 = vld [vmem:[#allocation14] ss:$0 sm:$0xff] }
 0x4a7   :  { %v880_v50 = vsel %vm741_vm2, %v874_v47, 0.0 }
 0x4a8   :  { %881 = vadd.xlane.f32.xlu1 %v880_v50 }
 0x4aa   :  { %628 = vadd.xlane.f32.xlu0 %v622_v51 }
 0x4ac   :  { %630 = vadd.xlane.f32.xlu1 %v625_v52 }
 0x533   :  { %v879_v53 = vpop.xlane.xlu0 %878 }
 0x534   :  { %v883_v54 = vmul.f32 0.015625, %v879_v53 }
 0x535   :  { %v882_v55 = vpop.xlane.xlu1 %881 }
 0x536   :  { %v885_v56 = vsub.f32 %v871_v43, %v883_v54  ;;  %v884_v57 = vmul.f32 0.015625, %v882_v55  ;;  %v1942_v43 = vld [vmem:[%s2925_s7 + $0x18] sm:$0xff]   ;;  %v1945_v54 = vld [vmem:[%s2925_s7 + $0x30] sm:$0xff]  }
 0x537   :  { %v629_v58 = vpop.xlane.xlu0 %628 }
 0x538   :  { %v886_v59 = vsub.f32 %v874_v47, %v884_v57  ;;  %v632_v60 = vmul.f32 0.0078125, %v629_v58  ;;  %v887_v61 = vmul.f32 %v885_v56, %v885_v56  ;;  %v1943_v47 = vld [vmem:[%s2925_s7 + $0x20] sm:$0xff]   ;;  %v1946_v57 = vld [vmem:[%s2925_s7 + $0x38] sm:$0xff]  }
 0x539   :  { %v631_v62 = vpop.xlane.xlu1 %630 }
 0x53a   :  { %v2816_v63 = vsub.f32 %v622_v51, %v632_v60  ;;  %v633_v1 = vmul.f32 0.0078125, %v631_v62  ;;  %v889_v2 = vsel %vm741_vm2, %v887_v61, 0.0  ;;  %v888_v3 = vmul.f32 %v886_v59, %v886_v59  ;;  %v1944_v51 = vld [vmem:[%s2925_s7 + $0x28] sm:$0xff]   ;;  %v1947_v61 = vld [vmem:[%s2926_s9] sm:$0xff]  }
 0x53b   :  { %890 = vadd.xlane.f32.xlu0 %v889_v2  ;;  %v1950_v2 = vld [vmem:[%s2927_s10] sm:$0xff]  }
 0x53c   :  { %v2819_v4 = vsub.f32 %v625_v52, %v633_v1  ;;  %v892_v5 = vsel %vm741_vm2, %v888_v3, 0.0  ;;  %v636_v6 = vmul.f32 %v2816_v63, %v2816_v63  ;;  %v1601_v52 = vld [vmem:[#allocation16] ss:$0 sm:$0xff]  ;;  %v1949_v1 = vld [vmem:[#allocation7] sm:$0xff]   ;;  %1804 = vmatpush3.bf16.msra.mxu1 %v1950_v2  ;;  %v1951_v3 = vld [vmem:[%s2927_s10 + $0x8] sm:$0xff]  }
 0x53d   :  { %893 = vadd.xlane.f32.xlu1 %v892_v5  ;;  %1805 = vmatprep.subr.bf16.mxu1 %v2465_v0 }
 0x53e   :  { %v637_v7 = vmul.f32 %v2819_v4, %v2819_v4 }
 0x53f   :  { %638 = vadd.xlane.f32.xlu0 %v636_v6 }
 0x540   :  { %1806 = vmatpush3.bf16.msra.mxu1 %v1951_v3 }
 0x541   :  { %640 = vadd.xlane.f32.xlu1 %v637_v7  ;;  %1811 = vmatprep.subr.bf16.mxu1 %v2465_v0 }
 0x5c8   :  { %v891_v12 = vpop.xlane.xlu0 %890 }
 0x5c9   :  { %v895_v13 = vmul.f32 0.015625, %v891_v12 }
 0x5ca   :  { %v894_v14 = vpop.xlane.xlu1 %893 }
 0x5cb   :  { %v897_v15 = vadd.f32 1e-05, %v895_v13  ;;  %v896_v16 = vmul.f32 0.015625, %v894_v14  ;;  %v1269_v13 = vld [vmem:[#allocation28] sm:$0xf] }
 0x5cc   :  { %v639_v26 = vpop.xlane.xlu0 %638 }
 0x5cd   :  { %1967 = vrsqrt.f32 %v897_v15  ;;  %v898_v17 = vadd.f32 1e-05, %v896_v16  ;;  %v642_v30 = vmul.f32 0.0078125, %v639_v26 }
 0x5ce   :  { %v641_v21 = vpop.xlane.xlu1 %640 }
 0x5cf   :  { %1969 = vrsqrt.f32 %v898_v17  ;;  %v643_v27 = vmul.f32 0.0078125, %v641_v21  ;;  %v644_v35 = vadd.f32 1e-05, %v642_v30  ;;  %v1281_v17 = vsel %vm1279_vm14, %v1269_v13, 0 }
 0x5d1   :  { %v645_v32 = vadd.f32 1e-05, %v643_v27 }
 0x5d3   :  { %1971 = vrsqrt.f32 %v645_v32 }
 0x5d4   :  { %1973 = vrsqrt.f32 %v644_v35 }
 0x5d7   :  { %v1968_v18 = vpop.eup %1967 }
 0x5d8   :  { %v901_v20 = vmul.f32 %v1968_v18, %v885_v56  ;;  %v1952_v18 = vld [vmem:[%s2929_s24] sm:$0xff]  }
 0x5d9   :  { %v1970_v22 = vpop.eup %1969 }
 0x5da   :  { %v910_v24 = vmul.f32 %v1614_v19, %v901_v20  ;;  %v902_v25 = vmul.f32 %v1970_v22, %v886_v59  ;;  %v1954_v20 = vld [vmem:[%s2613_s8 + $0x8] sm:$0xff]  }
 0x5dc   :  { %v919_v28 = vadd.f32 %v1615_v23, %v910_v24  ;;  %v911_v29 = vmul.f32 %v1614_v19, %v902_v25  ;;  %v1953_v19 = vld [vmem:[%s2613_s8] sm:$0xff]   ;;  %s2467_s8 = smov [#allocation31]  }
 0x5dd   :  { %v1972_v42 = vpop.eup %1971  ;;  %s1528_s19 = sshll.u32 %s2467_s8, 4  ;;  %s1529_s19 = int_to_ptr.vmem [resolvable:$true] %s1528_s19 }
 0x5de   :  { %v920_v31 = vadd.f32 %v1615_v23, %v911_v29  ;;  %vm921_vm7 = vcmp.gt.f32.partialorder %v919_v28, 0.0  ;;  %v923_v33 = vmul.f32 0.25, %v919_v28  ;;  %v1974_v44 = vpop.eup %1973  ;;  %v649_v45 = vmul.f32 %v1972_v42, %v2819_v4  ;;  %v1629_v4 = vld [vmem:[%s2928_s21] ss:$0 sm:$0xff]  ;;  %s2371_s5 = scalar_lea.vmem %s1529_s19, 256  ;;  %p2376_p5 = scmp.lt.s32.totalorder %s1529_s19, %s1529_s19 }
 0x5df   :  { %v648_v46 = vmul.f32 %v1974_v44, %v2816_v63  ;;  %v1948_v63 = vld [vmem:[%s2926_s9 + $0x8] sm:$0xff]   ;;  %p2372_p4 = scmp.ne.s32.totalorder %s1529_s19, %s2371_s5  ;;  %p2377_p6 = scmp.lt.s32.totalorder %s2371_s5, %s2371_s5 }
 0x5e0   :  { %vm922_vm8 = vcmp.gt.f32.partialorder %v920_v31, 0.0  ;;  %v924_v34 = vmul.f32 0.25, %v920_v31  ;;  %v925_v36 = vsel %vm921_vm7, %v919_v28, %v923_v33  ;;  %v658_v49 = vmul.f32 %v1600_v48, %v649_v45 }
 0x5e1   :  { %v657_v50 = vmul.f32 %v1600_v48, %v648_v46  ;;  %p2378_p7 = por %p2377_p6, %p2376_p5 }
 0x5e2   :  { %v926_v37 = vsel %vm922_vm8, %v920_v31, %v924_v34  ;;  %v667_v53 = vadd.f32 %v1601_v52, %v658_v49  ;;  %v1957_v49 = vld [vmem:[#allocation26] sm:$0xff]  }
 0x5e3   :  { %v944_v39 = vpack.c.bf16 %v926_v37, %v925_v36  ;;  %v666_v55 = vadd.f32 %v1601_v52, %v657_v50  ;;  %v1642_v52 = vld [vmem:[%s2623_s20] ss:$0 sm:$0xff]  ;;  %p2379_p8 = pnand %p2378_p7, %p2372_p4 }
 0x5e4   :  { %v671_v56 = vmul.f32 0.25, %v667_v53  ;;  %vm669_vm9 = vcmp.gt.f32.partialorder %v667_v53, 0.0 }
 0x5e5   :  { %1772 = vmatmul.mubr.msk.bf16.vlgmr.msra.gmra.mrb[8].mxu0 %vm741_vm2, %v944_v39  ;;  %v670_v58 = vmul.f32 0.25, %v666_v55  ;;  %vm668_vm10 = vcmp.gt.f32.partialorder %v666_v55, 0.0  ;;  %v1955_v39 = vld [vmem:[#allocation29] sm:$0xff]  }
 0x5e6   :  { %1776 = vmatpush3.bf16.msra.mxu0 %v1939_v38  ;;  %1791 = vmatprep.mubr.msk.bf16.mxu0 %vm2466_vm0, %v2465_v0  ;;  %v673_v59 = vsel %vm669_vm9, %v667_v53, %v671_v56 }
 0x5e7   :  { %1777 = vmatprep.subr.bf16.mxu0 %v2465_v0  ;;  %v672_v60 = vsel %vm668_vm10, %v666_v55, %v670_v58 }
 0x5e8   :  { %v927_v62 = vpack.c.bf16 %v673_v59, %v672_v60 }
 0x5ea   :  { %1778 = vmatpush3.bf16.msra.mxu0 %v1940_v40  ;;  %v1956_v40 = vld [vmem:[#allocation29 + $0x8] sm:$0xff]  }
 0x5eb   :  { %1779 = vmatprep.subr.bf16.mxu0 %v2465_v0 }
 0x5ee   :  { %1780 = vmatpush3.bf16.msra.mxu0 %v1941_v41 }
 0x5ef   :  { %1781 = vmatprep.subr.bf16.mxu0 %v2465_v0 }
 0x5f2   :  { %1782 = vmatpush3.bf16.msra.mxu0 %v1942_v43 }
 0x5f3   :  { %1783 = vmatprep.subr.bf16.mxu0 %v2465_v0 }
 0x5f6   :  { %1784 = vmatpush3.bf16.msra.mxu0 %v1943_v47 }
 0x5f7   :  { %1785 = vmatprep.subr.bf16.mxu0 %v2465_v0 }
 0x5fa   :  { %1786 = vmatpush3.bf16.msra.mxu0 %v1944_v51  ;;  %v1958_v51 = vld [vmem:[#allocation26 + $0x8] sm:$0xff]  }
 0x5fb   :  { %1787 = vmatprep.subr.bf16.mxu0 %v2465_v0 }
 0x5fe   :  { %1788 = vmatpush3.bf16.msra.mxu0 %v1945_v54 }
 0x5ff   :  { %1789 = vmatprep.subr.bf16.mxu0 %v2465_v0 }
 0x602   :  { %1790 = vmatpush3.bf16.msra.mxu0 %v1946_v57 }
 0x603   :  { %1795 = vmatprep.subr.bf16.mxu0 %v2465_v0 }
 0x605   :  { %1792 = vmatmul.mubr.bf16.vlgmr.msra.gmra.mrb[8].mxu0 %v927_v62 }
 0x606   :  { %1796 = vmatpush3.bf16.msra.mxu0 %v1947_v61  ;;  %1799 = vmatprep.mubr.msk.bf16.mxu0 %vm2466_vm0, %v2465_v0 }
 0x607   :  { %1797 = vmatprep.subr.bf16.mxu0 %v2465_v0 }
 0x60a   :  { %1798 = vmatpush3.bf16.msra.mxu0 %v1948_v63 }
 0x611   :  { %1800 = vmatmul.mubr.msk.bf16.vlgmr.msra.gmra.mrb[8].mxu0 %vm1142_vm11, %v1949_v1 }
 0x6e4   :  { %v1180_v5 = vpop.f32.mrb[8].mxu0 }
 0x6e5   :  { %v1841_v6 = vadd.f32 %v1629_v4, %v1180_v5  ;;  %v1801_v7 = vpop.f32.mrb[9].mxu0 }
 0x6e6   :  { %v1183_v8 = vpop.f32.mrb[10].mxu0 }
 0x6e7   :  { %v1191_v9 = vmul.f32 0.25, %v1841_v6  ;;  %v1842_v10 = vadd.f32 %v1629_v4, %v1183_v8  ;;  %v1802_v11 = vpop.f32.mrb[11].mxu0  ;;  %vm1189_vm12 = vcmp.gt.f32.partialorder %v1841_v6, 0.0 }
 0x6e9   :  { %vm1190_vm13 = vcmp.gt.f32.partialorder %v1842_v10, 0.0  ;;  %v1192_v12 = vmul.f32 0.25, %v1842_v10  ;;  %v1193_v14 = vsel %vm1189_vm12, %v1841_v6, %v1191_v9 }
 0x6eb   :  { %v1194_v15 = vsel %vm1190_vm13, %v1842_v10, %v1192_v12 }
 0x6ec   :  { %v1195_v16 = vpack.c.bf16 %v1194_v15, %v1193_v14 }
 0x6ee   :  { %1808 = vmatmul.mubr.msk.bf16.vlgmr.msra.gmra.mrb[8].mxu1 %vm1142_vm11, %v1195_v16 }
 0x6ef   :  { %1812 = vmatpush3.bf16.msra.mxu1 %v1281_v17  ;;  %1813 = vmatprep.mubr.msk.bf16.mxu1 %vm2466_vm0, %v2465_v0 }
 0x6f0   :  { %1817 = vmatprep.subr.bf16.mxu1 %v2465_v0 }
 0x6f6   :  { %1814 = vmatmul.mubr.msk.bf16.vlgmr.msra.gmra.mrb[12].mxu1 %vm1275_vm15, %v1952_v18 }
 0x6f7   :  { %1821 = vmatprep.mubr.msk.bf16.mxu1 %vm2466_vm0, %v2465_v0  ;;  %1818 = vmatpush3.bf16.msra.mxu1 %v1953_v19 }
 0x6f8   :  { %1819 = vmatprep.subr.bf16.mxu1 %v2465_v0 }
 0x6fb   :  { %1820 = vmatpush3.bf16.msra.mxu1 %v1954_v20 }
 0x6fc   :  { %1825 = vmatprep.subr.bf16.mxu1 %v2465_v0 }
 0x7c1   :  { %v1249_v21 = vpop.f32.mrb[8].mxu1 }
 0x7c2   :  { %v1258_v22 = vmul.f32 0.25, %v1249_v21  ;;  %v1809_v23 = vpop.f32.mrb[9].mxu1  ;;  %vm1256_vm1 = vcmp.gt.f32.partialorder %v1249_v21, 0.0 }
 0x7c3   :  { %v1252_v24 = vpop.f32.mrb[10].mxu1 }
 0x7c4   :  { %vm1257_vm2 = vcmp.gt.f32.partialorder %v1252_v24, 0.0  ;;  %v1259_v25 = vmul.f32 0.25, %v1252_v24  ;;  %v1810_v26 = vpop.f32.mrb[11].mxu1  ;;  %v1260_v27 = vsel %vm1256_vm1, %v1249_v21, %v1258_v22 }
 0x7c6   :  { %v1261_v28 = vsel %vm1257_vm2, %v1252_v24, %v1259_v25 }
 0x7c7   :  { %v1262_v29 = vpack.c.bf16 %v1261_v28, %v1260_v27 }
 0x7c9   :  { %v1317_v30 = vpop.f32.mrb[12].mxu1 }
 0x7ca   :  { %v1326_v31 = vmul.f32 0.25, %v1317_v30  ;;  %v1815_v32 = vpop.f32.mrb[13].mxu1  ;;  %vm1324_vm3 = vcmp.gt.f32.partialorder %v1317_v30, 0.0 }
 0x7cb   :  { %v1320_v33 = vpop.f32.mrb[14].mxu1 }
 0x7cc   :  { %vm1325_vm4 = vcmp.gt.f32.partialorder %v1320_v33, 0.0  ;;  %v1327_v34 = vmul.f32 0.25, %v1320_v33  ;;  %v1816_v35 = vpop.f32.mrb[15].mxu1  ;;  %v1328_v36 = vsel %vm1324_vm3, %v1317_v30, %v1326_v31 }
 0x7ce   :  { %v1329_v37 = vsel %vm1325_vm4, %v1320_v33, %v1327_v34 }
 0x7cf   :  { %v1330_v38 = vpack.c.bf16 %v1329_v37, %v1328_v36 }
 0x7d1   :  { %1822 = vmatmul.mubr.msk.bf16.vlgmr.msra.gmra.mrb[16].mxu1 %vm1142_vm11, %v1330_v38 }
 0x7d2   :  { %1829 = vmatprep.mubr.msk.bf16.mxu1 %vm2466_vm0, %v2465_v0  ;;  %1826 = vmatpush3.bf16.msra.mxu1 %v1955_v39 }
 0x7d3   :  { %1827 = vmatprep.subr.bf16.mxu1 %v2465_v0 }
 0x7d6   :  { %1828 = vmatpush3.bf16.msra.mxu1 %v1956_v40 }
 0x7d7   :  { %1833 = vmatprep.subr.bf16.mxu1 %v2465_v0 }
 0x8a4   :  { %v1384_v41 = vpop.f32.mrb[16].mxu1 }
 0x8a5   :  { %v1393_v42 = vmul.f32 0.25, %v1384_v41  ;;  %v1823_v43 = vpop.f32.mrb[17].mxu1  ;;  %vm1391_vm5 = vcmp.gt.f32.partialorder %v1384_v41, 0.0 }
 0x8a6   :  { %v1387_v44 = vpop.f32.mrb[18].mxu1 }
 0x8a7   :  { %vm1392_vm6 = vcmp.gt.f32.partialorder %v1387_v44, 0.0  ;;  %v1394_v45 = vmul.f32 0.25, %v1387_v44  ;;  %v1824_v46 = vpop.f32.mrb[19].mxu1  ;;  %v1395_v47 = vsel %vm1391_vm5, %v1384_v41, %v1393_v42 }
 0x8a9   :  { %v1396_v48 = vsel %vm1392_vm6, %v1387_v44, %v1394_v45 }
 0x8aa   :  { %v1397_v50 = vpack.c.bf16 %v1396_v48, %v1395_v47 }
 0x8ac   :  { %1830 = vmatmul.mubr.msk.bf16.vlgmr.msra.gmra.mrb[20].mxu1 %vm1142_vm11, %v1397_v50 }
 0x8ad   :  { %1834 = vmatpush3.bf16.msra.mxu1 %v1957_v49  ;;  %1837 = vmatprep.mubr.msk.bf16.mxu1 %vm2466_vm0, %v2465_v0 }
 0x8ae   :  { %1835 = vmatprep.subr.bf16.mxu1 %v2465_v0 }
 0x8b1   :  { %1836 = vmatpush3.bf16.msra.mxu1 %v1958_v51 }
 0x8b8   :  { %1838 = vmatmul.mubr.msk.bf16.vlgmr.msra.gmra.mrb[20].mxu1 %vm1142_vm11, %v1262_v29 }
 0x98b   :  { %v1514_v53 = vpop.f32.mrb[20].mxu1 }
 0x98c   :  { %v1843_v54 = vadd.f32 %v1642_v52, %v1514_v53  ;;  %v1839_v55 = vpop.f32.mrb[21].mxu1 }
 0x98d   :  { %v1517_v56 = vpop.f32.mrb[22].mxu1 }
 0x98e   :  { %1521 = vst [vmem:[#allocation31] sm:$0xff] %v1843_v54  ;;  %v1844_v57 = vadd.f32 %v1642_v52, %v1517_v56  ;;  %v1840_v58 = vpop.f32.mrb[23].mxu1 }
 0x990   :  { %1522 = vst [vmem:[#allocation31 + $0x8] sm:$0xff] %v1844_v57 }
 0x991   :  { %2382 = shalt.err (!%p2379_p8)
}
 0x992   :  { %s2383_s20 = scalar_lea.hbm %s2628_s17, 256 }
 0x993   :  { %p2384_p9 = scmp.ne.s32.totalorder %s2628_s17, %s2383_s20  ;;  %p2387_p10 = scmp.lt.u32.totalorder %s2383_s20, %s2628_s17 }
 0x995   :  { %p2389_p11 = pnand %p2387_p10, %p2384_p9 }
 0x997   :  { %2392 = shalt.err (!%p2389_p11)
}
 0x998   :  { %s2468_s11 = smov 128   ;;  %s2469_s15 = smov 8  }
 0x999   :  { %1534 = dma.vmem_to_hbm [thread:$0]  %s1529_s19, 256, %s2628_s17, [#allocation4], %s2468_s11, %s2468_s11, %s2469_s15  }
 0x99a   :  { %2413 = dma.done.wait [#allocation4], 256  }
 0x99b   :  { %2414 = vsyncadd [#allocation4], 4294967040 }
 0x99c   :  { %1538 = vsyncpa [#allocation3], 1 }
 0x99d   :  { %1539 = vsyncpa [#allocation6], 1 }
 0x99e   :  { %1540 = vsyncpa [#allocation9], 1 }
 0x99f   :  { %1541 = vsyncpa [#allocation12], 1 }
 0x9a0   :  { %1542 = vsyncpa [#allocation15], 1 }
 0x9a1   :  { %1543 = vsyncpa [#allocation18], 1 }
 0x9a2   :  { %1544 = vsyncpa [#allocation21], 1 }
 0x9a3   :  { %1545 = vsyncpa [#allocation24], 1 }
 0x9a4   :  { %1546 = vsyncpa [#allocation27], 1 }
 0x9a5   :  { %1547 = vsyncpa [#allocation30], 1 }
 0x9a6   :  { %1548 = vsyncpa [#allocation4], 1 }

</bundles_post_ra>
